<compile_context>
chip_gen: v7x
topology: tpu7x:2x2x1
jax: 0.10.0
libtpu: 0.0.40
codegen_flags: <defaults>
</compile_context>

<pallas_src>
import functools

import numpy as np
import jax
import jax.numpy as jnp
from jax import lax
from jax.experimental import pallas as pl
from jax.experimental.pallas import tpu as pltpu


# ---------------------------------------------------------------------------
# Host-side weight rearrangement: fold "nearest-upsample by r, then 3x3 conv
# (stride 1, pad 1)" into a single 3x3 conv on the coarse grid whose channels
# carry the r*r fine-pixel phases (space-to-depth identity).
# Channel packing of a rep tensor with block r and C channels:
#     idx = (ph * r + pw) * C + c      (ph/pw = row/col phase).
# ---------------------------------------------------------------------------
def s2d_conv_weights(w_hwio, r):
    kh, kw, ci, co = w_hwio.shape
    assert kh == 3 and kw == 3
    w = np.asarray(w_hwio, dtype=np.float32)
    wr = np.zeros((3, 3, r * r * ci, r * r * co), dtype=np.float32)
    for qh in range(r):                      # output phase (rows)
        for qw in range(r):                  # output phase (cols)
            for dh in (-1, 0, 1):            # fine-grid tap offsets
                for dw in (-1, 0, 1):
                    fh, fw = qh + dh, qw + dw
                    Dh = -1 if fh < 0 else (1 if fh >= r else 0)   # coarse tap
                    Dw = -1 if fw < 0 else (1 if fw >= r else 0)
                    ph, pw = fh - Dh * r, fw - Dw * r              # input phase
                    wr[Dh + 1, Dw + 1,
                       (ph * r + pw) * ci:(ph * r + pw + 1) * ci,
                       (qh * r + qw) * co:(qh * r + qw + 1) * co] += w[dh + 1, dw + 1]
    return jnp.asarray(wr)


# ---------------------------------------------------------------------------
# In-kernel 3x3 "same" conv on a phase-packed coarse grid, with the
# upsample-replication already folded into the weights.
# Zero-pad the (small) activation in VMEM, then 9 per-tap accumulating
# (H*W, C) x (C, Co) bf16 matmuls summed in f32.  No im2col buffer, no lane
# concats, 2-D MXU operands (M = H*W).
# ---------------------------------------------------------------------------
def _conv3x3_taps(x, w_ref, bias, *, relu):
    # x: (H, W, C) bf16; w_ref: Ref (9, C, Co) bf16; bias: (1, Co) f32.
    H, W, C = x.shape
    zrow = jnp.zeros((1, W, C), x.dtype)
    xp = jnp.concatenate([zrow, x, zrow], axis=0)                 # (H+2, W,   C)
    zcol = jnp.zeros((H + 2, 1, C), x.dtype)
    xp = jnp.concatenate([zcol, xp, zcol], axis=1)                # (H+2, W+2, C)

    acc = None
    for kh in range(3):
        for kw in range(3):
            patch = xp[kh:kh + H, kw:kw + W, :].reshape(H * W, C)  # bf16, free merge
            part = lax.dot_general(
                patch, w_ref[kh * 3 + kw],
                dimension_numbers=(((1,), (0,)), ((), ())),
                preferred_element_type=jnp.float32)                # (H*W, Co) f32
            acc = part if acc is None else acc + part
    acc = acc + bias                                               # (1, Co) broadcast
    if relu:
        acc = jnp.maximum(acc, 0.0)
    return acc                                                     # f32


def _decoder_kernel(p_ref, w1_ref, b1_ref, w2_ref, b2_ref, w3_ref, b3_ref,
                    o_ref, *, H, W):
    # conv1 + ReLU: input was pre-im2col'd in the wrapper -> single matmul.
    y1 = lax.dot_general(p_ref[0], w1_ref[...],                    # (H*W, hidden) f32
                         dimension_numbers=(((1,), (0,)), ((), ())),
                         preferred_element_type=jnp.float32)
    y1 = jnp.maximum(y1 + b1_ref[...], 0.0).astype(jnp.bfloat16)

    # conv2 + ReLU with upsample#1 folded into the weights (phase-packed out).
    y2 = _conv3x3_taps(y1.reshape(H, W, y1.shape[-1]), w2_ref, b2_ref[...],
                       relu=True).astype(jnp.bfloat16)             # (H*W, 4*hidden)

    # conv3 with upsample#2 folded into the weights (16 output phases packed).
    y3 = _conv3x3_taps(y2.reshape(H, W, y2.shape[-1]), w3_ref, b3_ref[...],
                       relu=False)                                 # (H*W, 16*Cout) f32

    o_ref[0] = y3.reshape(H, W, y3.shape[-1]).astype(o_ref.dtype)


def wave_decoder_forward(x_nchw, params):
    """Matches WaveDecoder.forward. Input NCHW (PyTorch layout); output NCHW."""
    B, Cin, H, W = x_nchw.shape
    w1, b1 = params["conv1"]["w"], params["conv1"]["b"]
    w2, b2 = params["conv2"]["w"], params["conv2"]["b"]
    w3, b3 = params["conv3"]["w"], params["conv3"]["b"]
    hidden = w1.shape[-1]
    Cout = w3.shape[-1]
    HW = H * W

    x = jnp.transpose(x_nchw, (0, 2, 3, 1))                       # NCHW -> NHWC

    # conv1 pre-im2col in the wrapper (Cin is tiny; avoids lane-1 layouts in-kernel).
    xp = jnp.pad(x, ((0, 0), (1, 1), (1, 1), (0, 0)))
    patches = jnp.concatenate(
        [xp[:, kh:kh + H, kw:kw + W, :] for kh in range(3) for kw in range(3)],
        axis=-1)                                                  # (B, H, W, 9*Cin)
    patches = patches.reshape(B, HW, 9 * Cin).astype(jnp.bfloat16)

    # --- Host-side weight prep (tiny). Replication fold: sum the space-to-depth
    # weights over the input-phase groups that the nearest-upsample makes identical.
    w1m = jnp.asarray(w1).reshape(9 * Cin, hidden).astype(jnp.bfloat16)

    wr2 = s2d_conv_weights(w2, 2)                                 # (3,3,4h,4h)
    w2f = wr2.reshape(3, 3, 4, hidden, 4 * hidden).sum(axis=2)    # fold 4 identical phases
    w2t = w2f.reshape(9, hidden, 4 * hidden).astype(jnp.bfloat16)

    wr3 = s2d_conv_weights(w3, 4)                                 # (3,3,16h,16*Cout)
    # input phase fh*4+fw of the 4x grid maps to y2 phase (fh//2, fw//2):
    w3f = wr3.reshape(3, 3, 2, 2, 2, 2, hidden, 16 * Cout).sum(axis=(3, 5))
    w3t = w3f.reshape(9, 4 * hidden, 16 * Cout).astype(jnp.bfloat16)

    # Biases stay per-output-phase (tiled, NOT summed).
    b1m = jnp.asarray(b1).reshape(1, hidden).astype(jnp.float32)
    b2m = jnp.tile(jnp.asarray(b2), 4).reshape(1, 4 * hidden).astype(jnp.float32)
    b3m = jnp.tile(jnp.asarray(b3), 16).reshape(1, 16 * Cout).astype(jnp.float32)

    kernel = functools.partial(_decoder_kernel, H=H, W=W)
    rep = pl.pallas_call(
        kernel,
        out_shape=jax.ShapeDtypeStruct((B, H, W, 16 * Cout), jnp.float32),
        grid_spec=pltpu.PrefetchScalarGridSpec(
            num_scalar_prefetch=0,
            grid=(B,),
            in_specs=[
                pl.BlockSpec((1, HW, 9 * Cin), lambda b: (b, 0, 0)),
                pl.BlockSpec(w1m.shape, lambda b: (0, 0)),
                pl.BlockSpec(b1m.shape, lambda b: (0, 0)),
                pl.BlockSpec(w2t.shape, lambda b: (0, 0, 0)),
                pl.BlockSpec(b2m.shape, lambda b: (0, 0)),
                pl.BlockSpec(w3t.shape, lambda b: (0, 0, 0)),
                pl.BlockSpec(b3m.shape, lambda b: (0, 0)),
            ],
            out_specs=pl.BlockSpec((1, H, W, 16 * Cout), lambda b: (b, 0, 0, 0)),
        ),
        compiler_params=pltpu.CompilerParams(
            dimension_semantics=("parallel",),
            vmem_limit_bytes=32 * 1024 * 1024,
        ),
    )(patches, w1m, b1m, w2t, b2m, w3t, b3m)

    # Wrapper-side depth-to-space: (B,H,W,4,4,Cout) phases -> (B,4H,4W,Cout).
    out = rep.reshape(B, H, W, 4, 4, Cout)
    out = jnp.transpose(out, (0, 1, 3, 2, 4, 5)).reshape(B, 4 * H, 4 * W, Cout)
    return jnp.transpose(out, (0, 3, 1, 2))                       # NHWC -> NCHW


# ---------------------------------------------------------------------------
# Parameters + pure-JAX reference (for a self-check).
# ---------------------------------------------------------------------------
def init_params(in_channels=1, out_channels=1, hidden=32, seed=0):
    key = jax.random.PRNGKey(seed)
    params = {}
    defs = [("conv1", in_channels, hidden),
            ("conv2", hidden, hidden),
            ("conv3", hidden, out_channels)]
    for name, cin, cout in defs:
        key, kw, kb = jax.random.split(key, 3)
        bound = 1.0 / np.sqrt(cin * 9)
        params[name] = {
            "w": jax.random.uniform(kw, (3, 3, cin, cout), jnp.float32, -bound, bound),
            "b": jax.random.uniform(kb, (cout,), jnp.float32, -bound, bound),
        }
    return params


def _reference_forward(x_nchw, params):
    x = jnp.transpose(x_nchw, (0, 2, 3, 1))

    def conv(x, w, b):
        y = lax.conv_general_dilated(x, w, window_strides=(1, 1), padding="SAME",
                                     dimension_numbers=("NHWC", "HWIO", "NHWC"))
        return y + b

    def up2(x):
        return jnp.repeat(jnp.repeat(x, 2, axis=1), 2, axis=2)

    y = jnp.maximum(conv(x, params["conv1"]["w"], params["conv1"]["b"]), 0.0)
    y = up2(y)
    y = jnp.maximum(conv(y, params["conv2"]["w"], params["conv2"]["b"]), 0.0)
    y = up2(y)
    y = conv(y, params["conv3"]["w"], params["conv3"]["b"])
    return jnp.transpose(y, (0, 3, 1, 2))


if __name__ == "__main__":
    B, Cin, H, W = 2, 1, 16, 16
    key = jax.random.PRNGKey(0)
    x = jax.random.normal(key, (B, Cin, H, W), jnp.float32)       # NCHW like PyTorch

    params = init_params(in_channels=Cin, out_channels=1, hidden=32, seed=0)

    out = jax.block_until_ready(wave_decoder_forward(x, params))
    assert out.shape == (B, 1, 4 * H, 4 * W), out.shape
    assert bool(jnp.all(jnp.isfinite(out)))

    ref = jax.block_until_ready(_reference_forward(x, params))
    err = float(jnp.max(jnp.abs(out - ref)))
    assert err < 3e-2, f"max abs err vs reference: {err}"

    print("KERNEL_OK")
</pallas_src>

<mosaic_0001>
module attributes {stable_mosaic.version = 11 : i64} {
  func.func @_decoder_kernel(%arg0: i32, %arg1: memref<1x256x9xbf16, #tpu.memory_space<vmem>>, %arg2: memref<9x32xbf16, #tpu.memory_space<vmem>>, %arg3: memref<1x32xf32, #tpu.memory_space<vmem>>, %arg4: memref<9x32x128xbf16, #tpu.memory_space<vmem>>, %arg5: memref<1x128xf32, #tpu.memory_space<vmem>>, %arg6: memref<9x128x16xbf16, #tpu.memory_space<vmem>>, %arg7: memref<1x16xf32, #tpu.memory_space<vmem>>, %arg8: memref<1x16x16x16xf32, #tpu.memory_space<vmem>>) attributes {dimension_semantics = [#tpu.dimension_semantics<parallel>], iteration_bounds = array<i64: 2>, scalar_prefetch = 0 : i64, scratch_operands = 0 : i64, tpu.core_type = #tpu.core_type<tc>, window_params = [{transform_indices = @transform_0, window_bounds = array<i64: 1, 256, 9>}, {pipeline_mode = #tpu.pipeline_mode<synchronous>, transform_indices = @transform_1, window_bounds = array<i64: 9, 32>}, {pipeline_mode = #tpu.pipeline_mode<synchronous>, transform_indices = @transform_2, window_bounds = array<i64: 1, 32>}, {pipeline_mode = #tpu.pipeline_mode<synchronous>, transform_indices = @transform_3, window_bounds = array<i64: 9, 32, 128>}, {pipeline_mode = #tpu.pipeline_mode<synchronous>, transform_indices = @transform_4, window_bounds = array<i64: 1, 128>}, {pipeline_mode = #tpu.pipeline_mode<synchronous>, transform_indices = @transform_5, window_bounds = array<i64: 9, 128, 16>}, {pipeline_mode = #tpu.pipeline_mode<synchronous>, transform_indices = @transform_6, window_bounds = array<i64: 1, 16>}, {transform_indices = @transform_7, window_bounds = array<i64: 1, 16, 16, 16>}]} {
    %c0 = arith.constant 0 : index
    %c0_0 = arith.constant 0 : index
    %c0_1 = arith.constant 0 : index
    %0 = vector.load %arg1[%c0, %c0_0, %c0_1] : memref<1x256x9xbf16, #tpu.memory_space<vmem>>, vector<1x256x9xbf16>
    %1 = vector.shape_cast %0 : vector<1x256x9xbf16> to vector<256x9xbf16>
    %c0_2 = arith.constant 0 : index
    %c0_3 = arith.constant 0 : index
    %2 = vector.load %arg2[%c0_2, %c0_3] : memref<9x32xbf16, #tpu.memory_space<vmem>>, vector<9x32xbf16>
    %cst = arith.constant dense<0.000000e+00> : vector<256x32xf32>
    %3 = tpu.matmul %1, %2, %cst {dimension_numbers = #tpu.dot_dimension_numbers<[1], [0], [0], [1], [0, 0, 1, 1], [], []>} : vector<256x9xbf16>, vector<9x32xbf16>, vector<256x32xf32> -> vector<256x32xf32>
    %c0_4 = arith.constant 0 : index
    %c0_5 = arith.constant 0 : index
    %4 = vector.load %arg3[%c0_4, %c0_5] : memref<1x32xf32, #tpu.memory_space<vmem>>, vector<1x32xf32>
    %5 = vector.broadcast %4 : vector<1x32xf32> to vector<256x32xf32>
    %6 = arith.addf %3, %5 : vector<256x32xf32>
    %cst_6 = arith.constant 0.000000e+00 : f32
    %7 = vector.broadcast %cst_6 : f32 to vector<256x32xf32>
    %8 = arith.maximumf %6, %7 : vector<256x32xf32>
    %9 = arith.truncf %8 : vector<256x32xf32> to vector<256x32xbf16>
    %10 = vector.shape_cast %9 : vector<256x32xbf16> to vector<16x16x32xbf16>
    %c0_7 = arith.constant 0 : index
    %c0_8 = arith.constant 0 : index
    %11 = vector.load %arg5[%c0_7, %c0_8] : memref<1x128xf32, #tpu.memory_space<vmem>>, vector<1x128xf32>
    %cst_9 = arith.constant 0.000000e+00 : bf16
    %12 = vector.broadcast %cst_9 : bf16 to vector<1x16x32xbf16>
    %13 = tpu.concatenate %12, %10, %12 in 0 : vector<1x16x32xbf16>, vector<16x16x32xbf16>, vector<1x16x32xbf16> -> vector<18x16x32xbf16>
    %cst_10 = arith.constant 0.000000e+00 : bf16
    %14 = vector.broadcast %cst_10 : bf16 to vector<18x1x32xbf16>
    %15 = tpu.concatenate %14, %13, %14 in 1 : vector<18x1x32xbf16>, vector<18x16x32xbf16>, vector<18x1x32xbf16> -> vector<18x18x32xbf16>
    %16 = vector.extract_strided_slice %15 {offsets = [0, 0, 0], sizes = [16, 16, 32], strides = [1, 1, 1]} : vector<18x18x32xbf16> to vector<16x16x32xbf16>
    %17 = vector.shape_cast %16 : vector<16x16x32xbf16> to vector<256x32xbf16>
    %c0_11 = arith.constant 0 : index
    %c0_12 = arith.constant 0 : index
    %c0_13 = arith.constant 0 : index
    %18 = vector.load %arg4[%c0_11, %c0_12, %c0_13] : memref<9x32x128xbf16, #tpu.memory_space<vmem>>, vector<1x32x128xbf16>
    %19 = vector.shape_cast %18 : vector<1x32x128xbf16> to vector<32x128xbf16>
    %cst_14 = arith.constant dense<0.000000e+00> : vector<256x128xf32>
    %20 = tpu.matmul %17, %19, %cst_14 {dimension_numbers = #tpu.dot_dimension_numbers<[1], [0], [0], [1], [0, 0, 1, 1], [], []>} : vector<256x32xbf16>, vector<32x128xbf16>, vector<256x128xf32> -> vector<256x128xf32>
    %21 = vector.extract_strided_slice %15 {offsets = [0, 1, 0], sizes = [16, 16, 32], strides = [1, 1, 1]} : vector<18x18x32xbf16> to vector<16x16x32xbf16>
    %22 = vector.shape_cast %21 : vector<16x16x32xbf16> to vector<256x32xbf16>
    %c1 = arith.constant 1 : index
    %c0_15 = arith.constant 0 : index
    %c0_16 = arith.constant 0 : index
    %23 = vector.load %arg4[%c1, %c0_15, %c0_16] : memref<9x32x128xbf16, #tpu.memory_space<vmem>>, vector<1x32x128xbf16>
    %24 = vector.shape_cast %23 : vector<1x32x128xbf16> to vector<32x128xbf16>
    %cst_17 = arith.constant dense<0.000000e+00> : vector<256x128xf32>
    %25 = tpu.matmul %22, %24, %cst_17 {dimension_numbers = #tpu.dot_dimension_numbers<[1], [0], [0], [1], [0, 0, 1, 1], [], []>} : vector<256x32xbf16>, vector<32x128xbf16>, vector<256x128xf32> -> vector<256x128xf32>
    %26 = arith.addf %20, %25 : vector<256x128xf32>
    %27 = vector.extract_strided_slice %15 {offsets = [0, 2, 0], sizes = [16, 16, 32], strides = [1, 1, 1]} : vector<18x18x32xbf16> to vector<16x16x32xbf16>
    %28 = vector.shape_cast %27 : vector<16x16x32xbf16> to vector<256x32xbf16>
    %c2 = arith.constant 2 : index
    %c0_18 = arith.constant 0 : index
    %c0_19 = arith.constant 0 : index
    %29 = vector.load %arg4[%c2, %c0_18, %c0_19] : memref<9x32x128xbf16, #tpu.memory_space<vmem>>, vector<1x32x128xbf16>
    %30 = vector.shape_cast %29 : vector<1x32x128xbf16> to vector<32x128xbf16>
    %cst_20 = arith.constant dense<0.000000e+00> : vector<256x128xf32>
    %31 = tpu.matmul %28, %30, %cst_20 {dimension_numbers = #tpu.dot_dimension_numbers<[1], [0], [0], [1], [0, 0, 1, 1], [], []>} : vector<256x32xbf16>, vector<32x128xbf16>, vector<256x128xf32> -> vector<256x128xf32>
    %32 = arith.addf %26, %31 : vector<256x128xf32>
    %33 = vector.extract_strided_slice %15 {offsets = [1, 0, 0], sizes = [16, 16, 32], strides = [1, 1, 1]} : vector<18x18x32xbf16> to vector<16x16x32xbf16>
    %34 = vector.shape_cast %33 : vector<16x16x32xbf16> to vector<256x32xbf16>
    %c3 = arith.constant 3 : index
    %c0_21 = arith.constant 0 : index
    %c0_22 = arith.constant 0 : index
    %35 = vector.load %arg4[%c3, %c0_21, %c0_22] : memref<9x32x128xbf16, #tpu.memory_space<vmem>>, vector<1x32x128xbf16>
    %36 = vector.shape_cast %35 : vector<1x32x128xbf16> to vector<32x128xbf16>
    %cst_23 = arith.constant dense<0.000000e+00> : vector<256x128xf32>
    %37 = tpu.matmul %34, %36, %cst_23 {dimension_numbers = #tpu.dot_dimension_numbers<[1], [0], [0], [1], [0, 0, 1, 1], [], []>} : vector<256x32xbf16>, vector<32x128xbf16>, vector<256x128xf32> -> vector<256x128xf32>
    %38 = arith.addf %32, %37 : vector<256x128xf32>
    %39 = vector.extract_strided_slice %15 {offsets = [1, 1, 0], sizes = [16, 16, 32], strides = [1, 1, 1]} : vector<18x18x32xbf16> to vector<16x16x32xbf16>
    %40 = vector.shape_cast %39 : vector<16x16x32xbf16> to vector<256x32xbf16>
    %c4 = arith.constant 4 : index
    %c0_24 = arith.constant 0 : index
    %c0_25 = arith.constant 0 : index
    %41 = vector.load %arg4[%c4, %c0_24, %c0_25] : memref<9x32x128xbf16, #tpu.memory_space<vmem>>, vector<1x32x128xbf16>
    %42 = vector.shape_cast %41 : vector<1x32x128xbf16> to vector<32x128xbf16>
    %cst_26 = arith.constant dense<0.000000e+00> : vector<256x128xf32>
    %43 = tpu.matmul %40, %42, %cst_26 {dimension_numbers = #tpu.dot_dimension_numbers<[1], [0], [0], [1], [0, 0, 1, 1], [], []>} : vector<256x32xbf16>, vector<32x128xbf16>, vector<256x128xf32> -> vector<256x128xf32>
    %44 = arith.addf %38, %43 : vector<256x128xf32>
    %45 = vector.extract_strided_slice %15 {offsets = [1, 2, 0], sizes = [16, 16, 32], strides = [1, 1, 1]} : vector<18x18x32xbf16> to vector<16x16x32xbf16>
    %46 = vector.shape_cast %45 : vector<16x16x32xbf16> to vector<256x32xbf16>
    %c5 = arith.constant 5 : index
    %c0_27 = arith.constant 0 : index
    %c0_28 = arith.constant 0 : index
    %47 = vector.load %arg4[%c5, %c0_27, %c0_28] : memref<9x32x128xbf16, #tpu.memory_space<vmem>>, vector<1x32x128xbf16>
    %48 = vector.shape_cast %47 : vector<1x32x128xbf16> to vector<32x128xbf16>
    %cst_29 = arith.constant dense<0.000000e+00> : vector<256x128xf32>
    %49 = tpu.matmul %46, %48, %cst_29 {dimension_numbers = #tpu.dot_dimension_numbers<[1], [0], [0], [1], [0, 0, 1, 1], [], []>} : vector<256x32xbf16>, vector<32x128xbf16>, vector<256x128xf32> -> vector<256x128xf32>
    %50 = arith.addf %44, %49 : vector<256x128xf32>
    %51 = vector.extract_strided_slice %15 {offsets = [2, 0, 0], sizes = [16, 16, 32], strides = [1, 1, 1]} : vector<18x18x32xbf16> to vector<16x16x32xbf16>
    %52 = vector.shape_cast %51 : vector<16x16x32xbf16> to vector<256x32xbf16>
    %c6 = arith.constant 6 : index
    %c0_30 = arith.constant 0 : index
    %c0_31 = arith.constant 0 : index
    %53 = vector.load %arg4[%c6, %c0_30, %c0_31] : memref<9x32x128xbf16, #tpu.memory_space<vmem>>, vector<1x32x128xbf16>
    %54 = vector.shape_cast %53 : vector<1x32x128xbf16> to vector<32x128xbf16>
    %cst_32 = arith.constant dense<0.000000e+00> : vector<256x128xf32>
    %55 = tpu.matmul %52, %54, %cst_32 {dimension_numbers = #tpu.dot_dimension_numbers<[1], [0], [0], [1], [0, 0, 1, 1], [], []>} : vector<256x32xbf16>, vector<32x128xbf16>, vector<256x128xf32> -> vector<256x128xf32>
    %56 = arith.addf %50, %55 : vector<256x128xf32>
    %57 = vector.extract_strided_slice %15 {offsets = [2, 1, 0], sizes = [16, 16, 32], strides = [1, 1, 1]} : vector<18x18x32xbf16> to vector<16x16x32xbf16>
    %58 = vector.shape_cast %57 : vector<16x16x32xbf16> to vector<256x32xbf16>
    %c7 = arith.constant 7 : index
    %c0_33 = arith.constant 0 : index
    %c0_34 = arith.constant 0 : index
    %59 = vector.load %arg4[%c7, %c0_33, %c0_34] : memref<9x32x128xbf16, #tpu.memory_space<vmem>>, vector<1x32x128xbf16>
    %60 = vector.shape_cast %59 : vector<1x32x128xbf16> to vector<32x128xbf16>
    %cst_35 = arith.constant dense<0.000000e+00> : vector<256x128xf32>
    %61 = tpu.matmul %58, %60, %cst_35 {dimension_numbers = #tpu.dot_dimension_numbers<[1], [0], [0], [1], [0, 0, 1, 1], [], []>} : vector<256x32xbf16>, vector<32x128xbf16>, vector<256x128xf32> -> vector<256x128xf32>
    %62 = arith.addf %56, %61 : vector<256x128xf32>
    %63 = vector.extract_strided_slice %15 {offsets = [2, 2, 0], sizes = [16, 16, 32], strides = [1, 1, 1]} : vector<18x18x32xbf16> to vector<16x16x32xbf16>
    %64 = vector.shape_cast %63 : vector<16x16x32xbf16> to vector<256x32xbf16>
    %c8 = arith.constant 8 : index
    %c0_36 = arith.constant 0 : index
    %c0_37 = arith.constant 0 : index
    %65 = vector.load %arg4[%c8, %c0_36, %c0_37] : memref<9x32x128xbf16, #tpu.memory_space<vmem>>, vector<1x32x128xbf16>
    %66 = vector.shape_cast %65 : vector<1x32x128xbf16> to vector<32x128xbf16>
    %cst_38 = arith.constant dense<0.000000e+00> : vector<256x128xf32>
    %67 = tpu.matmul %64, %66, %cst_38 {dimension_numbers = #tpu.dot_dimension_numbers<[1], [0], [0], [1], [0, 0, 1, 1], [], []>} : vector<256x32xbf16>, vector<32x128xbf16>, vector<256x128xf32> -> vector<256x128xf32>
    %68 = arith.addf %62, %67 : vector<256x128xf32>
    %69 = vector.broadcast %11 : vector<1x128xf32> to vector<256x128xf32>
    %70 = arith.addf %68, %69 : vector<256x128xf32>
    %cst_39 = arith.constant 0.000000e+00 : f32
    %71 = vector.broadcast %cst_39 : f32 to vector<256x128xf32>
    %72 = arith.maximumf %70, %71 : vector<256x128xf32>
    %73 = arith.truncf %72 : vector<256x128xf32> to vector<256x128xbf16>
    %74 = vector.shape_cast %73 : vector<256x128xbf16> to vector<16x16x128xbf16>
    %c0_40 = arith.constant 0 : index
    %c0_41 = arith.constant 0 : index
    %75 = vector.load %arg7[%c0_40, %c0_41] : memref<1x16xf32, #tpu.memory_space<vmem>>, vector<1x16xf32>
    %cst_42 = arith.constant 0.000000e+00 : bf16
    %76 = vector.broadcast %cst_42 : bf16 to vector<1x16x128xbf16>
    %77 = tpu.concatenate %76, %74, %76 in 0 : vector<1x16x128xbf16>, vector<16x16x128xbf16>, vector<1x16x128xbf16> -> vector<18x16x128xbf16>
    %cst_43 = arith.constant 0.000000e+00 : bf16
    %78 = vector.broadcast %cst_43 : bf16 to vector<18x1x128xbf16>
    %79 = tpu.concatenate %78, %77, %78 in 1 : vector<18x1x128xbf16>, vector<18x16x128xbf16>, vector<18x1x128xbf16> -> vector<18x18x128xbf16>
    %80 = vector.extract_strided_slice %79 {offsets = [0, 0, 0], sizes = [16, 16, 128], strides = [1, 1, 1]} : vector<18x18x128xbf16> to vector<16x16x128xbf16>
    %81 = vector.shape_cast %80 : vector<16x16x128xbf16> to vector<256x128xbf16>
    %c0_44 = arith.constant 0 : index
    %c0_45 = arith.constant 0 : index
    %c0_46 = arith.constant 0 : index
    %82 = vector.load %arg6[%c0_44, %c0_45, %c0_46] : memref<9x128x16xbf16, #tpu.memory_space<vmem>>, vector<1x128x16xbf16>
    %83 = vector.shape_cast %82 : vector<1x128x16xbf16> to vector<128x16xbf16>
    %cst_47 = arith.constant dense<0.000000e+00> : vector<256x16xf32>
    %84 = tpu.matmul %81, %83, %cst_47 {dimension_numbers = #tpu.dot_dimension_numbers<[1], [0], [0], [1], [0, 0, 1, 1], [], []>} : vector<256x128xbf16>, vector<128x16xbf16>, vector<256x16xf32> -> vector<256x16xf32>
    %85 = vector.extract_strided_slice %79 {offsets = [0, 1, 0], sizes = [16, 16, 128], strides = [1, 1, 1]} : vector<18x18x128xbf16> to vector<16x16x128xbf16>
    %86 = vector.shape_cast %85 : vector<16x16x128xbf16> to vector<256x128xbf16>
    %c1_48 = arith.constant 1 : index
    %c0_49 = arith.constant 0 : index
    %c0_50 = arith.constant 0 : index
    %87 = vector.load %arg6[%c1_48, %c0_49, %c0_50] : memref<9x128x16xbf16, #tpu.memory_space<vmem>>, vector<1x128x16xbf16>
    %88 = vector.shape_cast %87 : vector<1x128x16xbf16> to vector<128x16xbf16>
    %cst_51 = arith.constant dense<0.000000e+00> : vector<256x16xf32>
    %89 = tpu.matmul %86, %88, %cst_51 {dimension_numbers = #tpu.dot_dimension_numbers<[1], [0], [0], [1], [0, 0, 1, 1], [], []>} : vector<256x128xbf16>, vector<128x16xbf16>, vector<256x16xf32> -> vector<256x16xf32>
    %90 = arith.addf %84, %89 : vector<256x16xf32>
    %91 = vector.extract_strided_slice %79 {offsets = [0, 2, 0], sizes = [16, 16, 128], strides = [1, 1, 1]} : vector<18x18x128xbf16> to vector<16x16x128xbf16>
    %92 = vector.shape_cast %91 : vector<16x16x128xbf16> to vector<256x128xbf16>
    %c2_52 = arith.constant 2 : index
    %c0_53 = arith.constant 0 : index
    %c0_54 = arith.constant 0 : index
    %93 = vector.load %arg6[%c2_52, %c0_53, %c0_54] : memref<9x128x16xbf16, #tpu.memory_space<vmem>>, vector<1x128x16xbf16>
    %94 = vector.shape_cast %93 : vector<1x128x16xbf16> to vector<128x16xbf16>
    %cst_55 = arith.constant dense<0.000000e+00> : vector<256x16xf32>
    %95 = tpu.matmul %92, %94, %cst_55 {dimension_numbers = #tpu.dot_dimension_numbers<[1], [0], [0], [1], [0, 0, 1, 1], [], []>} : vector<256x128xbf16>, vector<128x16xbf16>, vector<256x16xf32> -> vector<256x16xf32>
    %96 = arith.addf %90, %95 : vector<256x16xf32>
    %97 = vector.extract_strided_slice %79 {offsets = [1, 0, 0], sizes = [16, 16, 128], strides = [1, 1, 1]} : vector<18x18x128xbf16> to vector<16x16x128xbf16>
    %98 = vector.shape_cast %97 : vector<16x16x128xbf16> to vector<256x128xbf16>
    %c3_56 = arith.constant 3 : index
    %c0_57 = arith.constant 0 : index
    %c0_58 = arith.constant 0 : index
    %99 = vector.load %arg6[%c3_56, %c0_57, %c0_58] : memref<9x128x16xbf16, #tpu.memory_space<vmem>>, vector<1x128x16xbf16>
    %100 = vector.shape_cast %99 : vector<1x128x16xbf16> to vector<128x16xbf16>
    %cst_59 = arith.constant dense<0.000000e+00> : vector<256x16xf32>
    %101 = tpu.matmul %98, %100, %cst_59 {dimension_numbers = #tpu.dot_dimension_numbers<[1], [0], [0], [1], [0, 0, 1, 1], [], []>} : vector<256x128xbf16>, vector<128x16xbf16>, vector<256x16xf32> -> vector<256x16xf32>
    %102 = arith.addf %96, %101 : vector<256x16xf32>
    %103 = vector.extract_strided_slice %79 {offsets = [1, 1, 0], sizes = [16, 16, 128], strides = [1, 1, 1]} : vector<18x18x128xbf16> to vector<16x16x128xbf16>
    %104 = vector.shape_cast %103 : vector<16x16x128xbf16> to vector<256x128xbf16>
    %c4_60 = arith.constant 4 : index
    %c0_61 = arith.constant 0 : index
    %c0_62 = arith.constant 0 : index
    %105 = vector.load %arg6[%c4_60, %c0_61, %c0_62] : memref<9x128x16xbf16, #tpu.memory_space<vmem>>, vector<1x128x16xbf16>
    %106 = vector.shape_cast %105 : vector<1x128x16xbf16> to vector<128x16xbf16>
    %cst_63 = arith.constant dense<0.000000e+00> : vector<256x16xf32>
    %107 = tpu.matmul %104, %106, %cst_63 {dimension_numbers = #tpu.dot_dimension_numbers<[1], [0], [0], [1], [0, 0, 1, 1], [], []>} : vector<256x128xbf16>, vector<128x16xbf16>, vector<256x16xf32> -> vector<256x16xf32>
    %108 = arith.addf %102, %107 : vector<256x16xf32>
    %109 = vector.extract_strided_slice %79 {offsets = [1, 2, 0], sizes = [16, 16, 128], strides = [1, 1, 1]} : vector<18x18x128xbf16> to vector<16x16x128xbf16>
    %110 = vector.shape_cast %109 : vector<16x16x128xbf16> to vector<256x128xbf16>
    %c5_64 = arith.constant 5 : index
    %c0_65 = arith.constant 0 : index
    %c0_66 = arith.constant 0 : index
    %111 = vector.load %arg6[%c5_64, %c0_65, %c0_66] : memref<9x128x16xbf16, #tpu.memory_space<vmem>>, vector<1x128x16xbf16>
    %112 = vector.shape_cast %111 : vector<1x128x16xbf16> to vector<128x16xbf16>
    %cst_67 = arith.constant dense<0.000000e+00> : vector<256x16xf32>
    %113 = tpu.matmul %110, %112, %cst_67 {dimension_numbers = #tpu.dot_dimension_numbers<[1], [0], [0], [1], [0, 0, 1, 1], [], []>} : vector<256x128xbf16>, vector<128x16xbf16>, vector<256x16xf32> -> vector<256x16xf32>
    %114 = arith.addf %108, %113 : vector<256x16xf32>
    %115 = vector.extract_strided_slice %79 {offsets = [2, 0, 0], sizes = [16, 16, 128], strides = [1, 1, 1]} : vector<18x18x128xbf16> to vector<16x16x128xbf16>
    %116 = vector.shape_cast %115 : vector<16x16x128xbf16> to vector<256x128xbf16>
    %c6_68 = arith.constant 6 : index
    %c0_69 = arith.constant 0 : index
    %c0_70 = arith.constant 0 : index
    %117 = vector.load %arg6[%c6_68, %c0_69, %c0_70] : memref<9x128x16xbf16, #tpu.memory_space<vmem>>, vector<1x128x16xbf16>
    %118 = vector.shape_cast %117 : vector<1x128x16xbf16> to vector<128x16xbf16>
    %cst_71 = arith.constant dense<0.000000e+00> : vector<256x16xf32>
    %119 = tpu.matmul %116, %118, %cst_71 {dimension_numbers = #tpu.dot_dimension_numbers<[1], [0], [0], [1], [0, 0, 1, 1], [], []>} : vector<256x128xbf16>, vector<128x16xbf16>, vector<256x16xf32> -> vector<256x16xf32>
    %120 = arith.addf %114, %119 : vector<256x16xf32>
    %121 = vector.extract_strided_slice %79 {offsets = [2, 1, 0], sizes = [16, 16, 128], strides = [1, 1, 1]} : vector<18x18x128xbf16> to vector<16x16x128xbf16>
    %122 = vector.shape_cast %121 : vector<16x16x128xbf16> to vector<256x128xbf16>
    %c7_72 = arith.constant 7 : index
    %c0_73 = arith.constant 0 : index
    %c0_74 = arith.constant 0 : index
    %123 = vector.load %arg6[%c7_72, %c0_73, %c0_74] : memref<9x128x16xbf16, #tpu.memory_space<vmem>>, vector<1x128x16xbf16>
    %124 = vector.shape_cast %123 : vector<1x128x16xbf16> to vector<128x16xbf16>
    %cst_75 = arith.constant dense<0.000000e+00> : vector<256x16xf32>
    %125 = tpu.matmul %122, %124, %cst_75 {dimension_numbers = #tpu.dot_dimension_numbers<[1], [0], [0], [1], [0, 0, 1, 1], [], []>} : vector<256x128xbf16>, vector<128x16xbf16>, vector<256x16xf32> -> vector<256x16xf32>
    %126 = arith.addf %120, %125 : vector<256x16xf32>
    %127 = vector.extract_strided_slice %79 {offsets = [2, 2, 0], sizes = [16, 16, 128], strides = [1, 1, 1]} : vector<18x18x128xbf16> to vector<16x16x128xbf16>
    %128 = vector.shape_cast %127 : vector<16x16x128xbf16> to vector<256x128xbf16>
    %c8_76 = arith.constant 8 : index
    %c0_77 = arith.constant 0 : index
    %c0_78 = arith.constant 0 : index
    %129 = vector.load %arg6[%c8_76, %c0_77, %c0_78] : memref<9x128x16xbf16, #tpu.memory_space<vmem>>, vector<1x128x16xbf16>
    %130 = vector.shape_cast %129 : vector<1x128x16xbf16> to vector<128x16xbf16>
    %cst_79 = arith.constant dense<0.000000e+00> : vector<256x16xf32>
    %131 = tpu.matmul %128, %130, %cst_79 {dimension_numbers = #tpu.dot_dimension_numbers<[1], [0], [0], [1], [0, 0, 1, 1], [], []>} : vector<256x128xbf16>, vector<128x16xbf16>, vector<256x16xf32> -> vector<256x16xf32>
    %132 = arith.addf %126, %131 : vector<256x16xf32>
    %133 = vector.broadcast %75 : vector<1x16xf32> to vector<256x16xf32>
    %134 = arith.addf %132, %133 : vector<256x16xf32>
    %135 = vector.shape_cast %134 : vector<256x16xf32> to vector<16x16x16xf32>
    %c0_80 = arith.constant 0 : index
    %c0_81 = arith.constant 0 : index
    %c0_82 = arith.constant 0 : index
    %c0_83 = arith.constant 0 : index
    %136 = vector.load %arg8[%c0_80, %c0_81, %c0_82, %c0_83] : memref<1x16x16x16xf32, #tpu.memory_space<vmem>>, vector<1x16x16x16xf32>
    %137 = vector.shape_cast %136 : vector<1x16x16x16xf32> to vector<16x16x16xf32>
    %138 = vector.shape_cast %135 : vector<16x16x16xf32> to vector<1x16x16x16xf32>
    tpu.vector_store %arg8[%c0_80, %c0_81, %c0_82, %c0_83], %138 {strides = array<i32>} : memref<1x16x16x16xf32, #tpu.memory_space<vmem>>, vector<1x16x16x16xf32>,
    return
  }
  func.func @transform_0(%arg0: i32) -> (i32, i32, i32) {
    %c0_i32 = arith.constant 0 : i32
    %c0_i32_0 = arith.constant 0 : i32
    %c0_i32_1 = arith.constant 0 : i32
    return %arg0, %c0_i32, %c0_i32_0 : i32, i32, i32
  }
  func.func @transform_1(%arg0: i32) -> (i32, i32) {
    %c0_i32 = arith.constant 0 : i32
    %c0_i32_0 = arith.constant 0 : i32
    %c0_i32_1 = arith.constant 0 : i32
    return %c0_i32, %c0_i32_0 : i32, i32
  }
  func.func @transform_2(%arg0: i32) -> (i32, i32) {
    %c0_i32 = arith.constant 0 : i32
    %c0_i32_0 = arith.constant 0 : i32
    %c0_i32_1 = arith.constant 0 : i32
    return %c0_i32, %c0_i32_0 : i32, i32
  }
  func.func @transform_3(%arg0: i32) -> (i32, i32, i32) {
    %c0_i32 = arith.constant 0 : i32
    %c0_i32_0 = arith.constant 0 : i32
    %c0_i32_1 = arith.constant 0 : i32
    %c0_i32_2 = arith.constant 0 : i32
    return %c0_i32, %c0_i32_0, %c0_i32_1 : i32, i32, i32
  }
  func.func @transform_4(%arg0: i32) -> (i32, i32) {
    %c0_i32 = arith.constant 0 : i32
    %c0_i32_0 = arith.constant 0 : i32
    %c0_i32_1 = arith.constant 0 : i32
    return %c0_i32, %c0_i32_0 : i32, i32
  }
  func.func @transform_5(%arg0: i32) -> (i32, i32, i32) {
    %c0_i32 = arith.constant 0 : i32
    %c0_i32_0 = arith.constant 0 : i32
    %c0_i32_1 = arith.constant 0 : i32
    %c0_i32_2 = arith.constant 0 : i32
    return %c0_i32, %c0_i32_0, %c0_i32_1 : i32, i32, i32
  }
  func.func @transform_6(%arg0: i32) -> (i32, i32) {
    %c0_i32 = arith.constant 0 : i32
    %c0_i32_0 = arith.constant 0 : i32
    %c0_i32_1 = arith.constant 0 : i32
    return %c0_i32, %c0_i32_0 : i32, i32
  }
  func.func @transform_7(%arg0: i32) -> (i32, i32, i32, i32) {
    %c0_i32 = arith.constant 0 : i32
    %c0_i32_0 = arith.constant 0 : i32
    %c0_i32_1 = arith.constant 0 : i32
    %c0_i32_2 = arith.constant 0 : i32
    return %arg0, %c0_i32, %c0_i32_0, %c0_i32_1 : i32, i32, i32, i32
  }
}

</mosaic_0001>

<bundles_post_ra>
// kernel: tpu_custom_call.1
= control target key start
LH: loop header
LB: loop body
LE: loop exit
PB: predicated region body
PF: predicated region fallthrough
CT: control target
= control target key end

     0   :  { %12 = vsyncpa [#allocation3], 0  ;;  %s10219_s0 = inlined_call_operand.vmem [shape: bf16[2,256,9], index: 0, kind: input, shape index: {}]   ;;  %s10220_s1 = inlined_call_operand.vmem [shape: bf16[9,32], index: 1, kind: input, shape index: {}]   ;;  %s10221_s2 = inlined_call_operand.vmem [shape: f32[1,32], index: 2, kind: input, shape index: {}]   ;;  %s10222_s3 = inlined_call_operand.vmem [shape: bf16[9,32,128], index: 3, kind: input, shape index: {}]   ;;  %s10223_s4 = inlined_call_operand.vmem [shape: f32[1,128], index: 4, kind: input, shape index: {}]   ;;  %s10224_s5 = inlined_call_operand.vmem [shape: bf16[9,128,16], index: 5, kind: input, shape index: {}]   ;;  %s10225_s6 = inlined_call_operand.vmem [shape: f32[1,16], index: 6, kind: input, shape index: {}]   ;;  %s10226_s7 = inlined_call_operand.hbm [shape: f32[2,16,16,16], index: 7, kind: output, shape index: {}]  }
   0x1   :  { %14 = vsyncpa [#allocation3 + $0x1], 0  ;;  %s8488_s24 = smov 0   ;;  %s8490_s25 = smov 0  }
   0x2   :  { %s8492_s26 = smov 0   ;;  %s8494_s27 = smov 0  }
   0x3 LB: > { %s8509_s28 = sadd.s32 4294967295, %s8441_s27   ;;  %s6086_s29 = sadd.s32 4294967294, %s8441_s27   ;;  %s8441_s27 = sphi %s8494_s27, %s10241_s27   ;;  %s8437_s26 = sphi %s8492_s26, %s10240_s26   ;;  %s8433_s25 = sphi %s8490_s25, %s10239_s25   ;;  %s8429_s24 = sphi %s8488_s24, %s10238_s24  }
   0x4   : > { %s8513_s30 = sadd.s32 1, %s8441_s27   ;;  %s179_s8 = sadd.s32 1, %s8437_s26 }
   0x5   : > { %s176_s9 = ssub.s32 %s8441_s27, %s8513_s30  ;;  %p189_p0 = scmp.ne.s32.totalorder %s8437_s26, %s8433_s25 }
   0x6   : > { %p177_p1 = scmp.eq.s32.totalorder %s176_s9, 0  ;;  %p190_p2 = scmp.eq.s32.totalorder %s8509_s28, 1 }
   0x7   : > { %p195_p3 = scmp.ne.s32.totalorder %s8433_s25, %s8429_s24  ;;  %p196_p4 = scmp.eq.s32.totalorder %s6086_s29, 1 }
   0x8   : > { %s8524_s10 = scalar_select %p177_p1, %s8437_s26, %s179_s8  }
   0x9   : > { %p8526_p5 = por %p190_p2, %p189_p0  ;;  %p8530_p6 = por %p196_p4, %p195_p3 }
   0xa   : > { %p6089_p7 = scmp.ge.s32.totalorder %s8441_s27, 1  ;;  %p240_p8 = scmp.lt.s32.totalorder %s8441_s27, 3 }
   0xc   : > { %p241_p9 = pnand %p6089_p7, %p240_p8 }
   0xe   : > { %244 = sbr.rel (%p241_p9) target bundleno = 1829 (0x725), region = 48 }
  0x15   : > { %v8272_v0 = vld [vmem:[%s10220_s1] sm:$0x1f]   ;;  %vm453_vm0 = vcmask 1043456   ;;  %vm454_vm1 = vcmask 1044480   ;;  %p272_p10 = scmp.lt.s32.totalorder %s8509_s28, 1  ;;  %v8443_v1 = vmov 65535  }
  0x16   : > { %v455_v2 = vsel %vm453_vm0, 4294967295, %v8443_v1  ;;  %v8289_v3 = vld [vmem:[%s10222_s3 + $0x10] sm:$0xff]   ;;  %vm404_vm2 = vcmask 72704   ;;  %vm823_vm3 = vcmask 1040384   ;;  %vm824_vm4 = vsmask.f32 256 }
  0x17   : > { %v456_v4 = vsel %vm454_vm1, %v455_v2, 0  ;;  %s273_s17 = scalar_select %p272_p10, %s8509_s28, 1  ;;  %v8444_v22 = vmov 0   ;;  %vm8581_vm5 = vmand %vm823_vm3, %vm824_vm4  ;;  %v8290_v26 = vld [vmem:[%s10222_s3 + $0x18] sm:$0xff]   ;;  %vm864_vm6 = vsmask.f32 7424 }
  0x18   : > { %v458_v5 = vand.u32 %v8272_v0, %v456_v4  ;;  %v673_v23 = vrot.slane %v8444_v22, 7  ;;  %vm1074_vm7 = vcmask 261120   ;;  %v8608_v35 = vld [vmem:[%s10222_s3] sm:$0xff]   ;;  %vm1521_vm8 = vcmask 1046528   ;;  %v8356_v24 = vld [vmem:[%s10224_s5 + $0x188] sm:$0xff]   ;;  %s269_s22 = sand.u32 1, %s8433_s25  }
  0x19   : > { %s6528_s18 = sshll.u32 %s273_s17, 7  ;;  %v8614_v36 = vld [vmem:[%s10221_s2] ss:$0 sm:$0xff]  ;;  %s6090_s23 = sshll.u32 %s269_s22, 8  ;;  %vm5977_vm9 = vcmask 130048  }
  0x1a   : > { %6925 = vmatprep.subr.bf16.mxu0 %v458_v5  ;;  %s8547_s21 = scalar_lea.vmem %s10219_s0, %s6528_s18  ;;  %7715 = vmatprep.subr.bf16.mxu1 %v458_v5  ;;  %v8587_v25 = vsel %vm8581_vm5, 0, %v673_v23  ;;  %v8595_v28 = vsel %vm8581_vm5, %v673_v23, 0  ;;  %s10071_s9 = scalar_lea.vmem [#allocation2], %s6090_s23 }
  0x1b   : > { %6926 = vmatpush3.bf16.msra.mxu0 %v458_v5  ;;  %v8273_v6 = vld [vmem:[%s8547_s21] sm:$0xff]   ;;  %7716 = vmatpush3.bf16.msra.mxu1 %v458_v5  ;;  %v8274_v7 = vld [vmem:[%s8547_s21 + $0x8] sm:$0xff]   ;;  %v8275_v8 = vld [vmem:[%s8547_s21 + $0x10] sm:$0xff]   ;;  %v868_v27 = vshll.u32 %v8587_v25, 16  ;;  %v866_v29 = vshrl.u32 %v8587_v25, 16  ;;  %v873_v31 = vshll.u32 %v8595_v28, 16 }
  0x1c   : > { %6959 = vmatprep.subr.bf16.mxu1 %v8289_v3  ;;  %6927 = vmatprep.mubr.msk.bf16.mxu0 %vm404_vm2, %v8273_v6  ;;  %v8276_v9 = vld [vmem:[%s8547_s21 + $0x18] sm:$0xff]   ;;  %v8277_v10 = vld [vmem:[%s8547_s21 + $0x20] sm:$0xff]   ;;  %v8282_v12 = vld [vmem:[%s8547_s21 + $0x48] sm:$0xff]   ;;  %s6529_s13 = sshll.u32 %s8509_s28, 12  ;;  %s6024_s14 = sshll.u32 %s10071_s9, 4  ;;  %s10167_s14 = int_to_ptr.vmem [resolvable:$true] %s6024_s14 }
  0x1d   : > { %v8281_v11 = vld [vmem:[%s8547_s21 + $0x40] sm:$0xff]   ;;  %v8283_v13 = vld [vmem:[%s8547_s21 + $0x50] sm:$0xff]   ;;  %v8278_v14 = vld [vmem:[%s8547_s21 + $0x28] sm:$0xff]   ;;  %v870_v30 = vrot.slane %v868_v27, 1  ;;  %v875_v33 = vrot.slane %v873_v31, 1  ;;  %s10165_s17 = scalar_lea.hbm %s10226_s7, %s6529_s13  ;;  %s10178_s28 = scalar_lea.sflag [#allocation3], %s269_s22 }
  0x1e   : > { %6928 = vmatmul.mubr.msk.bf16.vlgmr.msra.gmra.mrb[0].mxu0 %vm404_vm2, %v8274_v7  ;;  %6943 = vmatprep.mubr.msk.bf16.mxu1 %vm404_vm2, %v8281_v11  ;;  %v8279_v15 = vld [vmem:[%s8547_s21 + $0x30] sm:$0xff]   ;;  %v8284_v16 = vld [vmem:[%s8547_s21 + $0x58] sm:$0xff]   ;;  %v8285_v17 = vld [vmem:[%s8547_s21 + $0x60] sm:$0xff]   ;;  %s8379_s18 = scalar_lea.vmem %s10167_s14, 4096  ;;  %s8445_s19 = smov [#allocation2]  }
  0x1f   : > { %6931 = vmatprep.mubr.msk.bf16.mxu0 %vm404_vm2, %v8275_v8  ;;  %6944 = vmatmul.mubr.msk.bf16.vlgmr.msra.gmra.mrb[0].mxu1 %vm404_vm2, %v8282_v12  ;;  %v8280_v18 = vld [vmem:[%s8547_s21 + $0x38] sm:$0xff]   ;;  %v8286_v19 = vld [vmem:[%s8547_s21 + $0x68] sm:$0xff]   ;;  %v8287_v20 = vld [vmem:[%s8547_s21 + $0x70] sm:$0xff]   ;;  %v871_v32 = vor.u32 %v870_v30, %v866_v29  ;;  %p8380_p11 = scmp.ne.s32.totalorder %s10167_s14, %s8379_s18  ;;  %s8383_s20 = sshll.u32 %s8445_s19, 4  ;;  %s8384_s20 = int_to_ptr.vmem [resolvable:$false] %s8383_s20 }
  0x20   : > { %6947 = vmatprep.mubr.msk.bf16.mxu1 %vm404_vm2, %v8283_v13  ;;  %6960 = vmatpush3.bf16.msra.mxu1 %v8289_v3  ;;  %v8288_v21 = vld [vmem:[%s8547_s21 + $0x78] sm:$0xff]   ;;  %s8385_s21 = scalar_lea.vmem %s8384_s20, 8192  ;;  %p8386_p0 = scmp.lt.s32.totalorder %s10167_s14, %s8384_s20 }
  0x21   : > { %6961 = vmatprep.subr.bf16.mxu1 %v8290_v26  ;;  %v8600_v34 = vsel %vm864_vm6, %v871_v32, %v875_v33  ;;  %p8381_p12 = pnand %p8380_p11, %p8526_p5  ;;  %p8387_p1 = scmp.lt.s32.totalorder %s8385_s21, %s8379_s18 }
  0x22   : > { %10234 = vst [vmem:[#allocation5_spill] sm:$0xff] %v8600_v34 }
  0x23   : > { %p8382_p13 = pneg %p8381_p12  ;;  %p8388_p2 = por %p8387_p1, %p8386_p0 }
  0x24   : > { %6962 = vmatpush3.bf16.msra.mxu1 %v8290_v26 }
  0x25   : > { %6995 = vmatprep.subr.bf16.mxu1 %v8608_v35  ;;  %p8389_p3 = pnand %p8388_p2, %p8382_p13 }
  0x26   : > { %6932 = vmatmul.mubr.msk.bf16.gmra.mrb[4].mxu0 %vm404_vm2, %v8276_v9 }
  0x27   : > { %6935 = vmatprep.mubr.msk.bf16.mxu0 %vm404_vm2, %v8277_v10  ;;  %6948 = vmatmul.mubr.msk.bf16.gmra.mrb[4].mxu1 %vm404_vm2, %v8284_v16 }
  0x28   : > { %6951 = vmatprep.mubr.msk.bf16.mxu1 %vm404_vm2, %v8285_v17 }
  0x2e   : > { %6936 = vmatmul.mubr.msk.bf16.gmra.mrb[8].mxu0 %vm404_vm2, %v8278_v14 }
  0x2f   : > { %6939 = vmatprep.mubr.msk.bf16.mxu0 %vm404_vm2, %v8279_v15  ;;  %6952 = vmatmul.mubr.msk.bf16.gmra.mrb[8].mxu1 %vm404_vm2, %v8286_v19 }
  0x30   : > { %6955 = vmatprep.mubr.msk.bf16.mxu1 %vm404_vm2, %v8287_v20 }
  0x36   : > { %6940 = vmatmul.mubr.msk.bf16.gmra.mrb[12].mxu0 %vm404_vm2, %v8280_v18 }
  0x37   : > { %6956 = vmatmul.mubr.msk.bf16.gmra.mrb[12].mxu1 %vm404_vm2, %v8288_v21  ;;  %7299 = vmatprep.mubr.bf16.mxu0 %v8600_v34 }
  0x38   : > { %6963 = vmatprep.mubr.msk.bf16.mxu1 %vm1074_vm7, %v8600_v34 }
  0xf1   : > { %v6929_v37 = vpop.f32.mrb[0].mxu0 }
  0xf2   : > { %v503_v38 = vadd.f32 %v6929_v37, %v8614_v36  ;;  %v494_v39 = vpop.f32.mrb[1].mxu0  ;;  %v6945_v52 = vpop.f32.mrb[0].mxu1 }
  0xf3   : > { %v495_v40 = vadd.f32 %v8614_v36, %v494_v39  ;;  %v6930_v41 = vpop.f32.mrb[2].mxu0  ;;  %v558_v56 = vpop.f32.mrb[1].mxu1  ;;  %v8627_v8 = vadd.f32 %v6945_v52, %v8614_v36 }
  0xf4   : > { %v506_v42 = vadd.f32 %v6930_v41, %v8614_v36  ;;  %v497_v43 = vpop.f32.mrb[3].mxu0  ;;  %v623_v45 = vmax.f32 %v503_v38, 0.0  ;;  %v6946_v60 = vpop.f32.mrb[2].mxu1  ;;  %v8638_v15 = vadd.f32 %v8614_v36, %v558_v56 }
  0xf5   : > { %v498_v44 = vadd.f32 %v8614_v36, %v497_v43  ;;  %v621_v47 = vmax.f32 %v495_v40, 0.0  ;;  %v8623_v1 = vpop.f32.mrb[3].mxu1  ;;  %v639_v26 = vmax.f32 %v8627_v8, 0.0  ;;  %v570_v29 = vadd.f32 %v6946_v60, %v8614_v36 }
  0xf6   : > { %v624_v46 = vmax.f32 %v506_v42, 0.0 }
  0xf7   : > { %v622_v48 = vmax.f32 %v498_v44, 0.0 }
  0xf8   : > { %v654_v49 = vpack.c.bf16 %v624_v46, %v623_v45 }
  0xf9   : > { %v653_v50 = vpack.c.bf16 %v622_v48, %v621_v47  ;;  %v6933_v51 = vpop.f32.mrb[4].mxu0 }
  0xfa   : > { %v685_v53 = vshrl.u32 %v654_v49, 16  ;;  %v519_v54 = vadd.f32 %v6933_v51, %v8614_v36  ;;  %v510_v55 = vpop.f32.mrb[5].mxu0  ;;  %v688_v62 = vshll.u32 %v654_v49, 16  ;;  %v8649_v21 = vpop.f32.mrb[4].mxu1 }
  0xfb   : > { %v678_v57 = vshrl.u32 %v653_v50, 16  ;;  %v511_v58 = vadd.f32 %v8614_v36, %v510_v55  ;;  %v6934_v59 = vpop.f32.mrb[6].mxu0  ;;  %v681_v3 = vshll.u32 %v653_v50, 16  ;;  %v8655_v30 = vpop.f32.mrb[5].mxu1 }
  0xfc   : > { %v687_v61 = vrot.slane %v685_v53, 7  ;;  %v522_v63 = vadd.f32 %v6934_v59, %v8614_v36  ;;  %v513_v0 = vpop.f32.mrb[7].mxu0  ;;  %v627_v6 = vmax.f32 %v519_v54, 0.0  ;;  %v8659_v39 = vpop.f32.mrb[6].mxu1 }
  0xfd   : > { %v680_v2 = vrot.slane %v678_v57, 7  ;;  %v514_v4 = vadd.f32 %v8614_v36, %v513_v0  ;;  %v625_v11 = vmax.f32 %v511_v58, 0.0  ;;  %v8664_v45 = vpop.f32.mrb[7].mxu1  ;;  %v8292_v58 = vld [vmem:[%s10222_s3 + $0x8] sm:$0xff]  }
  0xfe   : > { %v690_v5 = vor.u32 %v688_v62, %v687_v61  ;;  %v628_v7 = vmax.f32 %v522_v63, 0.0  ;;  %v8642_v16 = vsel %vm8581_vm5, %v687_v61, 0 }
  0xff   : > { %v683_v9 = vor.u32 %v681_v3, %v680_v2  ;;  %v8631_v10 = vsel %vm8581_vm5, %v680_v2, 0  ;;  %v626_v12 = vmax.f32 %v514_v4, 0.0  ;;  %v897_v44 = vshll.u32 %v8642_v16, 16 }
 0x100   : > { %v8635_v13 = vsel %vm8581_vm5, 0, %v690_v5  ;;  %v656_v14 = vpack.c.bf16 %v628_v7, %v627_v6  ;;  %v885_v18 = vshll.u32 %v8631_v10, 16  ;;  %v640_v4 = vmax.f32 %v570_v29, 0.0 }
 0x101   : > { %v8646_v17 = vsel %vm8581_vm5, 0, %v683_v9  ;;  %v655_v19 = vpack.c.bf16 %v626_v12, %v625_v11  ;;  %v6937_v20 = vpop.f32.mrb[8].mxu0  ;;  %v892_v27 = vshll.u32 %v8635_v13, 16  ;;  %v890_v49 = vshrl.u32 %v8635_v13, 16 }
 0x102   : > { %v880_v22 = vshll.u32 %v8646_v17, 16  ;;  %v526_v23 = vpop.f32.mrb[9].mxu0  ;;  %v699_v31 = vshrl.u32 %v656_v14, 16  ;;  %v535_v33 = vadd.f32 %v6937_v20, %v8614_v36  ;;  %v878_v42 = vshrl.u32 %v8646_v17, 16  ;;  %v8676_v5 = vpop.f32.mrb[8].mxu1 }
 0x103   : > { %v692_v32 = vshrl.u32 %v655_v19, 16  ;;  %v527_v37 = vadd.f32 %v8614_v36, %v526_v23  ;;  %v6938_v38 = vpop.f32.mrb[10].mxu0  ;;  %v887_v46 = vrot.slane %v885_v18, 1  ;;  %v695_v50 = vshll.u32 %v655_v19, 16  ;;  %v8683_v12 = vpop.f32.mrb[9].mxu1 }
 0x104   : > { %v538_v40 = vadd.f32 %v6938_v38, %v8614_v36  ;;  %v529_v41 = vpop.f32.mrb[11].mxu0  ;;  %v882_v43 = vrot.slane %v880_v22, 1  ;;  %v631_v51 = vmax.f32 %v535_v33, 0.0  ;;  %v701_v54 = vrot.slane %v699_v31, 7  ;;  %v8689_v23 = vpop.f32.mrb[10].mxu1 }
 0x105   : > { %v694_v47 = vrot.slane %v692_v32, 7  ;;  %v530_v48 = vadd.f32 %v8614_v36, %v529_v41  ;;  %v629_v55 = vmax.f32 %v527_v37, 0.0  ;;  %v894_v57 = vrot.slane %v892_v27, 1  ;;  %v8703_v32 = vpop.f32.mrb[11].mxu1 }
 0x106   : > { %v632_v52 = vmax.f32 %v538_v40, 0.0  ;;  %v883_v53 = vor.u32 %v882_v43, %v878_v42  ;;  %v702_v59 = vshll.u32 %v656_v14, 16  ;;  %v899_v3 = vrot.slane %v897_v44, 1 }
 0x107   : > { %v630_v56 = vmax.f32 %v530_v48, 0.0  ;;  %v697_v60 = vor.u32 %v695_v50, %v694_v47  ;;  %v895_v2 = vor.u32 %v894_v57, %v890_v49  ;;  %v637_v9 = vmax.f32 %v8638_v15, 0.0 }
 0x108   : > { %v658_v61 = vpack.c.bf16 %v632_v52, %v631_v51  ;;  %v8672_v62 = vsel %vm864_vm6, %v883_v53, %v887_v46  ;;  %v562_v11 = vadd.f32 %v8614_v36, %v8623_v1  ;;  %v704_v14 = vor.u32 %v702_v59, %v701_v54 }
 0x109   : > { %v657_v63 = vpack.c.bf16 %v630_v56, %v629_v55  ;;  %v6941_v0 = vpop.f32.mrb[12].mxu0  ;;  %6964 = vmatmul.mubr.msk.bf16.vlgmr.msra.gmra.mrb[16].mxu1 %vm1074_vm7, %v8672_v62  ;;  %v8687_v20 = vsel %vm864_vm6, %v895_v2, %v899_v3  ;;  %v8698_v1 = vsel %vm8581_vm5, %v701_v54, 0  ;;  %v662_v31 = vpack.c.bf16 %v640_v4, %v639_v26 }
 0x10a   : > { %v713_v6 = vshrl.u32 %v658_v61, 16  ;;  %v551_v7 = vadd.f32 %v6941_v0, %v8614_v36  ;;  %6996 = vmatpush3.bf16.msra.mxu1 %v8608_v35  ;;  %v542_v8 = vpop.f32.mrb[13].mxu0  ;;  %v8694_v35 = vld [vmem:[%s10222_s3 + $0x20] sm:$0xff]   ;;  %6967 = vmatprep.mubr.msk.bf16.mxu1 %vm1074_vm7, %v8687_v20  ;;  %v8707_v33 = vsel %vm8581_vm5, 0, %v697_v60  ;;  %v638_v40 = vmax.f32 %v562_v11, 0.0  ;;  %v8724_v57 = vpop.f32.mrb[12].mxu1 }
 0x10b   : > { %v706_v18 = vshrl.u32 %v657_v63, 16  ;;  %v543_v19 = vadd.f32 %v8614_v36, %v542_v8  ;;  %v6942_v22 = vpop.f32.mrb[14].mxu0  ;;  %6997 = vmatprep.subr.bf16.mxu1 %v8292_v58  ;;  %v716_v41 = vshll.u32 %v658_v61, 16  ;;  %v741_v44 = vshrl.u32 %v662_v31, 16 }
 0x10c   : > { %v715_v15 = vrot.slane %v713_v6, 7  ;;  %v554_v27 = vadd.f32 %v6942_v22, %v8614_v36  ;;  %v545_v29 = vpop.f32.mrb[15].mxu0  ;;  %v635_v42 = vmax.f32 %v551_v7, 0.0  ;;  %v8712_v46 = vsel %vm8581_vm5, %v694_v47, 0 }
 0x10d   : > { %v708_v37 = vrot.slane %v706_v18, 7  ;;  %v546_v38 = vadd.f32 %v8614_v36, %v545_v29  ;;  %v709_v26 = vshll.u32 %v657_v63, 16  ;;  %v633_v48 = vmax.f32 %v543_v19, 0.0  ;;  %v8732_v63 = vpop.f32.mrb[13].mxu1 }
 0x10e   : > { %v636_v43 = vmax.f32 %v554_v27, 0.0  ;;  %6998 = vmatpush3.bf16.msra.mxu1 %v8292_v58  ;;  %v8717_v50 = vsel %vm8581_vm5, 0, %v704_v14  ;;  %v718_v51 = vor.u32 %v716_v41, %v715_v15  ;;  %v661_v53 = vpack.c.bf16 %v638_v40, %v637_v9  ;;  %v8735_v6 = vpop.f32.mrb[14].mxu1 }
 0x10f   : > { %v634_v49 = vmax.f32 %v546_v38, 0.0  ;;  %7031 = vmatprep.subr.bf16.mxu1 %v8694_v35  ;;  %v8721_v54 = vsel %vm8581_vm5, %v715_v15, 0  ;;  %v711_v55 = vor.u32 %v709_v26, %v708_v37  ;;  %v904_v47 = vshll.u32 %v8707_v33, 16  ;;  %v8740_v14 = vpop.f32.mrb[15].mxu1 }
 0x110   : > { %v660_v52 = vpack.c.bf16 %v636_v43, %v635_v42  ;;  %v8728_v58 = vsel %vm8581_vm5, %v708_v37, 0  ;;  %v8730_v60 = vrot.slane %v741_v44, 7  ;;  %v744_v61 = vshll.u32 %v662_v31, 16 }
 0x111   : > { %v659_v56 = vpack.c.bf16 %v634_v49, %v633_v48  ;;  %v734_v3 = vshrl.u32 %v661_v53, 16  ;;  %v902_v4 = vshrl.u32 %v8707_v33, 16  ;;  %v737_v8 = vshll.u32 %v661_v53, 16 }
 0x112   : > { %v727_v59 = vshrl.u32 %v660_v52, 16  ;;  %v730_v0 = vshll.u32 %v660_v52, 16  ;;  %v906_v9 = vrot.slane %v904_v47, 1  ;;  %v909_v11 = vshll.u32 %v8712_v46, 16 }
 0x113   : > { %v720_v2 = vshrl.u32 %v659_v56, 16  ;;  %v723_v19 = vshll.u32 %v659_v56, 16  ;;  %v8742_v22 = vrot.slane %v734_v3, 7  ;;  %v583_v15 = vadd.f32 %v8649_v21, %v8614_v36 }
 0x114   : > { %v8737_v7 = vrot.slane %v727_v59, 7  ;;  %v8748_v27 = vsel %vm8581_vm5, 0, %v718_v51  ;;  %v907_v31 = vor.u32 %v906_v9, %v902_v4  ;;  %v911_v37 = vrot.slane %v909_v11, 1 }
 0x115   : > { %v722_v18 = vrot.slane %v720_v2, 7  ;;  %v8753_v38 = vsel %vm8581_vm5, 0, %v711_v55  ;;  %v8756_v41 = vor.u32 %v744_v61, %v8730_v60  ;;  %v914_v42 = vshrl.u32 %v8717_v50, 16 }
 0x116   : > { %v732_v29 = vor.u32 %v730_v0, %v8737_v7  ;;  %v739_v43 = vor.u32 %v737_v8, %v8742_v22  ;;  %v8765_v44 = vsel %vm864_vm6, %v907_v31, %v911_v37  ;;  %v916_v26 = vshll.u32 %v8717_v50, 16 }
 0x117   : > { %v725_v40 = vor.u32 %v723_v19, %v722_v18  ;;  %v8761_v21 = vsel %vm8581_vm5, %v722_v18, 0  ;;  %6968 = vmatmul.mubr.msk.bf16.gmra.mrb[20].mxu1 %vm1074_vm7, %v8765_v44  ;;  %v643_v49 = vmax.f32 %v583_v15, 0.0  ;;  %v921_v51 = vshll.u32 %v8698_v1, 16 }
 0x118   : > { %v8770_v48 = vsel %vm8581_vm5, 0, %v732_v29  ;;  %v575_v52 = vadd.f32 %v8614_v36, %v8655_v30  ;;  %v918_v55 = vrot.slane %v916_v26, 1  ;;  %v586_v56 = vadd.f32 %v8659_v39, %v8614_v36 }
 0x119   : > { %v8779_v53 = vsel %vm8581_vm5, 0, %v725_v40  ;;  %v578_v47 = vadd.f32 %v8614_v36, %v8664_v45  ;;  %v923_v59 = vrot.slane %v921_v51, 1  ;;  %v928_v0 = vshll.u32 %v8753_v38, 16 }
 0x11a   : > { %v641_v61 = vmax.f32 %v575_v52, 0.0  ;;  %v933_v2 = vshll.u32 %v8728_v58, 16  ;;  %v919_v3 = vor.u32 %v918_v55, %v914_v42  ;;  %v644_v4 = vmax.f32 %v586_v56, 0.0 }
 0x11b   : > { %v642_v30 = vmax.f32 %v578_v47, 0.0  ;;  %v599_v8 = vadd.f32 %v8676_v5, %v8614_v36  ;;  %v926_v9 = vshrl.u32 %v8753_v38, 16  ;;  %v930_v11 = vrot.slane %v928_v0, 1 }
 0x11c   : > { %v935_v18 = vrot.slane %v933_v2, 1  ;;  %v940_v39 = vshll.u32 %v8748_v27, 16  ;;  %v8792_v45 = vsel %vm864_vm6, %v919_v3, %v923_v59  ;;  %v664_v19 = vpack.c.bf16 %v644_v4, %v643_v49 }
 0x11d   : > { %v663_v15 = vpack.c.bf16 %v642_v30, %v641_v61  ;;  %v938_v29 = vshrl.u32 %v8748_v27, 16  ;;  %6971 = vmatprep.mubr.msk.bf16.mxu1 %vm1074_vm7, %v8792_v45  ;;  %v931_v31 = vor.u32 %v930_v11, %v926_v9  ;;  %v945_v5 = vshll.u32 %v8721_v54, 16 }
 0x11e   : > { %v942_v37 = vrot.slane %v940_v39, 1  ;;  %v591_v40 = vadd.f32 %v8614_v36, %v8683_v12  ;;  %v755_v42 = vshrl.u32 %v664_v19, 16  ;;  %v758_v26 = vshll.u32 %v664_v19, 16 }
 0x11f   : > { %v748_v51 = vshrl.u32 %v663_v15, 16  ;;  %v647_v52 = vmax.f32 %v599_v8, 0.0  ;;  %v751_v55 = vshll.u32 %v663_v15, 16  ;;  %v8801_v49 = vsel %vm864_vm6, %v931_v31, %v935_v18 }
 0x120   : > { %v943_v56 = vor.u32 %v942_v37, %v938_v29  ;;  %v947_v47 = vrot.slane %v945_v5, 1  ;;  %v757_v59 = vrot.slane %v755_v42, 7  ;;  %6972 = vmatmul.mubr.msk.bf16.gmra.mrb[24].mxu1 %vm1074_vm7, %v8801_v49  ;;  %v602_v0 = vadd.f32 %v8689_v23, %v8614_v36 }
 0x121   : > { %v750_v61 = vrot.slane %v748_v51, 7  ;;  %v594_v12 = vadd.f32 %v8614_v36, %v8703_v32  ;;  %v645_v3 = vmax.f32 %v591_v40, 0.0  ;;  %v952_v4 = vshll.u32 %v8779_v53, 16 }
 0x122   : > { %v8810_v2 = vsel %vm864_vm6, %v943_v56, %v947_v47  ;;  %v957_v30 = vshll.u32 %v8761_v21, 16  ;;  %v8817_v8 = vsel %vm8581_vm5, %v8737_v7, 0  ;;  %v8821_v9 = vsel %vm8581_vm5, 0, %v739_v43 }
 0x123   : > { %v8826_v23 = vsel %vm8581_vm5, %v8742_v22, 0  ;;  %6975 = vmatprep.mubr.msk.bf16.mxu1 %vm1074_vm7, %v8810_v2  ;;  %v950_v32 = vshrl.u32 %v8779_v53, 16  ;;  %v760_v11 = vor.u32 %v758_v26, %v757_v59  ;;  %v648_v18 = vmax.f32 %v602_v0, 0.0 }
 0x124   : > { %v646_v39 = vmax.f32 %v594_v12, 0.0  ;;  %v954_v19 = vrot.slane %v952_v4, 1  ;;  %v753_v7 = vor.u32 %v751_v55, %v750_v61  ;;  %v959_v15 = vrot.slane %v957_v30, 1 }
 0x125   : > { %v615_v43 = vadd.f32 %v8724_v57, %v8614_v36  ;;  %v962_v29 = vshrl.u32 %v8770_v48, 16  ;;  %v666_v31 = vpack.c.bf16 %v648_v18, %v647_v52  ;;  %v964_v5 = vshll.u32 %v8770_v48, 16 }
 0x126   : > { %v665_v37 = vpack.c.bf16 %v646_v39, %v645_v3  ;;  %v955_v22 = vor.u32 %v954_v19, %v950_v32  ;;  %v969_v42 = vshll.u32 %v8817_v8, 16  ;;  %v607_v26 = vadd.f32 %v8614_v36, %v8732_v63 }
 0x127   : > { %v651_v40 = vmax.f32 %v615_v43, 0.0  ;;  %v618_v51 = vadd.f32 %v8735_v6, %v8614_v36  ;;  %v769_v55 = vshrl.u32 %v666_v31, 16  ;;  %v772_v56 = vshll.u32 %v666_v31, 16 }
 0x128   : > { %v762_v47 = vshrl.u32 %v665_v37, 16  ;;  %v765_v57 = vshll.u32 %v665_v37, 16  ;;  %v8841_v0 = vsel %vm864_vm6, %v955_v22, %v959_v15  ;;  %v966_v52 = vrot.slane %v964_v5, 1 }
 0x129   : > { %v971_v12 = vrot.slane %v969_v42, 1  ;;  %v649_v3 = vmax.f32 %v607_v26, 0.0  ;;  %v771_v4 = vrot.slane %v769_v55, 7  ;;  %6976 = vmatmul.mubr.msk.bf16.gmra.mrb[28].mxu1 %vm1074_vm7, %v8841_v0  ;;  %v652_v32 = vmax.f32 %v618_v51, 0.0 }
 0x12a   : > { %v764_v30 = vrot.slane %v762_v47, 7  ;;  %v610_v63 = vadd.f32 %v8614_v36, %v8740_v14  ;;  %v967_v6 = vor.u32 %v966_v52, %v962_v29  ;;  %v974_v18 = vshrl.u32 %v8821_v9, 16 }
 0x12b   : > { %v976_v39 = vshll.u32 %v8821_v9, 16  ;;  %v981_v19 = vshll.u32 %v8826_v23, 16  ;;  %v8853_v15 = vsel %vm8581_vm5, 0, %v8756_v41  ;;  %v8858_v43 = vsel %vm8581_vm5, %v8730_v60, 0 }
 0x12c   : > { %v8862_v36 = vsel %vm8581_vm5, 0, %v753_v7  ;;  %v8865_v14 = vsel %vm864_vm6, %v967_v6, %v971_v12  ;;  %v8867_v29 = vpack.c.bf16 %v652_v32, %v651_v40  ;;  %v650_v31 = vmax.f32 %v610_v63, 0.0 }
 0x12d   : > { %v978_v37 = vrot.slane %v976_v39, 1  ;;  %v8871_v41 = vsel %vm8581_vm5, 0, %v760_v11  ;;  %v8875_v22 = vsel %vm8581_vm5, %v757_v59, 0  ;;  %v8879_v60 = vsel %vm8581_vm5, %v750_v61, 0  ;;  %6979 = vmatprep.mubr.msk.bf16.mxu1 %vm1074_vm7, %v8865_v14 }
 0x12e   : > { %v983_v7 = vrot.slane %v981_v19, 1  ;;  %v774_v5 = vor.u32 %v772_v56, %v771_v4  ;;  %v767_v40 = vor.u32 %v765_v57, %v764_v30  ;;  %v667_v42 = vpack.c.bf16 %v650_v31, %v649_v3 }
 0x12f   : > { %v979_v26 = vor.u32 %v978_v37, %v974_v18  ;;  %v986_v51 = vshrl.u32 %v8853_v15, 16  ;;  %v988_v11 = vshll.u32 %v8853_v15, 16  ;;  %v993_v55 = vshll.u32 %v8858_v43, 16 }
 0x130   : > { %v1000_v59 = vshll.u32 %v8862_v36, 16  ;;  %v776_v47 = vshrl.u32 %v667_v42, 16  ;;  %v779_v52 = vshll.u32 %v667_v42, 16  ;;  %v998_v12 = vshrl.u32 %v8862_v36, 16 }
 0x131   : > { %v8888_v61 = vsel %vm864_vm6, %v979_v26, %v983_v7  ;;  %v990_v56 = vrot.slane %v988_v11, 1  ;;  %v995_v57 = vrot.slane %v993_v55, 1  ;;  %v1005_v32 = vshll.u32 %v8879_v60, 16 }
 0x132   : > { %6980 = vmatmul.mubr.msk.bf16.gmra.mrb[32].mxu1 %vm1074_vm7, %v8888_v61  ;;  %v1002_v3 = vrot.slane %v1000_v59, 1  ;;  %v8896_v63 = vsel %vm8581_vm5, 0, %v767_v40  ;;  %v778_v6 = vrot.slane %v776_v47, 7  ;;  %v8900_v18 = vsel %vm8581_vm5, 0, %v774_v5 }
 0x133   : > { %v991_v39 = vor.u32 %v990_v56, %v986_v51  ;;  %v1010_v19 = vshrl.u32 %v8871_v41, 16  ;;  %v1012_v31 = vshll.u32 %v8871_v41, 16  ;;  %v1007_v42 = vrot.slane %v1005_v32, 1 }
 0x134   : > { %v781_v37 = vor.u32 %v779_v52, %v778_v6  ;;  %v1003_v7 = vor.u32 %v1002_v3, %v998_v12  ;;  %v1017_v26 = vshll.u32 %v8875_v22, 16  ;;  %v8907_v11 = vsel %vm8581_vm5, %v764_v30, 0 }
 0x135   : > { %v8910_v40 = vsel %vm864_vm6, %v991_v39, %v995_v57  ;;  %v1014_v55 = vrot.slane %v1012_v31, 1  ;;  %v1024_v5 = vshll.u32 %v8896_v63, 16  ;;  %v8915_v51 = vsel %vm8581_vm5, %v771_v4, 0 }
 0x136   : > { %6983 = vmatprep.mubr.msk.bf16.mxu1 %vm1074_vm7, %v8910_v40  ;;  %v1019_v59 = vrot.slane %v1017_v26, 1  ;;  %v1022_v52 = vshrl.u32 %v8896_v63, 16  ;;  %v1036_v30 = vshll.u32 %v8900_v18, 16  ;;  %v8923_v12 = vsel %vm8581_vm5, 0, %v781_v37 }
 0x137   : > { %v1015_v47 = vor.u32 %v1014_v55, %v1010_v19  ;;  %v8926_v56 = vsel %vm864_vm6, %v1003_v7, %v1007_v42  ;;  %v1026_v57 = vrot.slane %v1024_v5, 1  ;;  %v1029_v4 = vshll.u32 %v8907_v11, 16 }
 0x138   : > { %v1034_v32 = vshrl.u32 %v8900_v18, 16  ;;  %v1038_v39 = vrot.slane %v1036_v30, 1  ;;  %v1041_v19 = vshll.u32 %v8915_v51, 16  ;;  %v1048_v7 = vshll.u32 %v8923_v12, 16 }
 0x139   : > { %v8932_v3 = vsel %vm864_vm6, %v1015_v47, %v1019_v59  ;;  %v1027_v31 = vor.u32 %v1026_v57, %v1022_v52  ;;  %v1031_v37 = vrot.slane %v1029_v4, 1  ;;  %v8941_v42 = vsel %vm8581_vm5, %v778_v6, 0 }
 0x13a   : > { %6984 = vmatmul.mubr.msk.bf16.gmra.mrb[36].mxu1 %vm1074_vm7, %v8926_v56  ;;  %v1039_v26 = vor.u32 %v1038_v39, %v1034_v32  ;;  %v1043_v55 = vrot.slane %v1041_v19, 1  ;;  %v1046_v59 = vshrl.u32 %v8923_v12, 16  ;;  %v1050_v47 = vrot.slane %v1048_v7, 1  ;;  %v8294_v32 = vld [vmem:[%s10222_s3 + $0x28] sm:$0xff]   ;;  %v8295_v39 = vld [vmem:[%s10222_s3 + $0x30] sm:$0xff]  }
 0x13b   : > { %6987 = vmatprep.mubr.msk.bf16.mxu1 %vm1074_vm7, %v8932_v3  ;;  %v8944_v5 = vsel %vm864_vm6, %v1027_v31, %v1031_v37  ;;  %v1053_v30 = vshll.u32 %v8941_v42, 16  ;;  %v1523_v19 = vrot.slane %v8595_v28, 1  ;;  %v1525_v37 = vrot.slane %v8646_v17, 1  ;;  %v8296_v28 = vld [vmem:[%s10222_s3 + $0x38] sm:$0xff]  }
 0x13c   : > { %v8951_v52 = vsel %vm864_vm6, %v1039_v26, %v1043_v55  ;;  %v1051_v6 = vor.u32 %v1050_v47, %v1046_v59  ;;  %v1528_v7 = vrot.slane %v8635_v13, 1  ;;  %v1526_v26 = vrot.slane %v8631_v10, 1  ;;  %v8297_v10 = vld [vmem:[%s10222_s3 + $0x40] sm:$0xff]  }
 0x13d   : > { %v1055_v57 = vrot.slane %v1053_v30, 1  ;;  %v1529_v55 = vrot.slane %v8642_v16, 1  ;;  %v1531_v16 = vrot.slane %v8707_v33, 1  ;;  %v1534_v30 = vrot.slane %v8717_v50, 1 }
 0x13e   : > { %v9014_v59 = vsel %vm1521_vm8, %v1525_v37, %v1526_v26  ;;  %v1543_v26 = vrot.slane %v8779_v53, 1 }
 0x13f   : > { %v8956_v4 = vsel %vm864_vm6, %v1051_v6, %v1055_v57  ;;  %v9019_v47 = vsel %vm1521_vm8, %v1528_v7, %v1529_v55  ;;  %v1532_v6 = vrot.slane %v8712_v46, 1  ;;  %v1535_v57 = vrot.slane %v8698_v1, 1 }
 0x140   : > { %v1540_v46 = vrot.slane %v8748_v27, 1  ;;  %v1541_v1 = vrot.slane %v8721_v54, 1  ;;  %v1546_v55 = vrot.slane %v8770_v48, 1  ;;  %v1547_v54 = vrot.slane %v8817_v8, 1 }
 0x141   : > { %v1553_v8 = vrot.slane %v8858_v43, 1  ;;  %v1559_v43 = vrot.slane %v8875_v22, 1  ;;  %v1565_v22 = vrot.slane %v8915_v51, 1  ;;  %v8298_v51 = vld [vmem:[%s10222_s3 + $0x48] sm:$0xff]  }
 0x142   : > { %6988 = vmatmul.mubr.msk.bf16.gmra.mrb[40].mxu1 %vm1074_vm7, %v8944_v5  ;;  %v9050_v7 = vsel %vm1521_vm8, %v1540_v46, %v1541_v1  ;;  %v1555_v46 = vrot.slane %v8862_v36, 1 }
 0x143   : > { %6991 = vmatprep.mubr.msk.bf16.mxu1 %vm1074_vm7, %v8951_v52 }
 0x14a   : > { %6992 = vmatmul.mubr.msk.bf16.gmra.mrb[44].mxu1 %vm1074_vm7, %v8956_v4 }
 0x14b   : > { %6999 = vmatprep.mubr.msk.bf16.mxu1 %vm1074_vm7, %v8587_v25 }
 0x152   : > { %7000 = vmatmul.mubr.msk.bf16.vlgmr.msra.gmra.mrb[16].mxu1 %vm1074_vm7, %v8646_v17 }
 0x153   : > { %7032 = vmatpush3.bf16.msra.mxu1 %v8694_v35  ;;  %7003 = vmatprep.mubr.msk.bf16.mxu1 %vm1074_vm7, %v8635_v13  ;;  %v1522_v35 = vrot.slane %v8587_v25, 1 }
 0x154   : > { %7033 = vmatprep.subr.bf16.mxu1 %v8294_v32 }
 0x155   : > { %v9000_v31 = vsel %vm1521_vm8, %v1522_v35, %v1523_v19  ;;  %v1537_v35 = vrot.slane %v8753_v38, 1  ;;  %v1538_v19 = vrot.slane %v8728_v58, 1  ;;  %v1544_v58 = vrot.slane %v8761_v21, 1 }
 0x156   : > { %v1552_v21 = vrot.slane %v8853_v15, 1 }
 0x157   : > { %7034 = vmatpush3.bf16.msra.mxu1 %v8294_v32  ;;  %v9031_v32 = vsel %vm1521_vm8, %v1531_v16, %v1532_v6  ;;  %v9045_v37 = vsel %vm1521_vm8, %v1537_v35, %v1538_v19  ;;  %v9064_v16 = vsel %vm1521_vm8, %v1546_v55, %v1547_v54  ;;  %v1550_v6 = vrot.slane %v8826_v23, 1 }
 0x158   : > { %7067 = vmatprep.subr.bf16.mxu1 %v8295_v39  ;;  %v9078_v35 = vsel %vm1521_vm8, %v1552_v21, %v1553_v8  ;;  %v1556_v23 = vrot.slane %v8879_v60, 1  ;;  %v1558_v19 = vrot.slane %v8871_v41, 1  ;;  %v1561_v55 = vrot.slane %v8896_v63, 1 }
 0x159   : > { %v1562_v60 = vrot.slane %v8907_v11, 1  ;;  %v1568_v11 = vrot.slane %v8941_v42, 1  ;;  %v8299_v42 = vld [vmem:[%s10222_s3 + $0x50] sm:$0xff]   ;;  %v786_v8 = vshll.u32 %v8867_v29, 16 }
 0x15a   : > { %7004 = vmatmul.mubr.msk.bf16.gmra.mrb[20].mxu1 %vm1074_vm7, %v8707_v33  ;;  %v9087_v1 = vsel %vm1521_vm8, %v1555_v46, %v1556_v23 }
 0x15b   : > { %7007 = vmatprep.mubr.msk.bf16.mxu1 %vm1074_vm7, %v8717_v50  ;;  %v9101_v54 = vsel %vm1521_vm8, %v1561_v55, %v1562_v60 }
 0x162   : > { %7008 = vmatmul.mubr.msk.bf16.gmra.mrb[24].mxu1 %vm1074_vm7, %v8753_v38 }
 0x163   : > { %7011 = vmatprep.mubr.msk.bf16.mxu1 %vm1074_vm7, %v8748_v27 }
 0x16a   : > { %7012 = vmatmul.mubr.msk.bf16.gmra.mrb[28].mxu1 %vm1074_vm7, %v8779_v53 }
 0x16b   : > { %7015 = vmatprep.mubr.msk.bf16.mxu1 %vm1074_vm7, %v8770_v48 }
 0x172   : > { %7016 = vmatmul.mubr.msk.bf16.gmra.mrb[32].mxu1 %vm1074_vm7, %v8821_v9 }
 0x173   : > { %7019 = vmatprep.mubr.msk.bf16.mxu1 %vm1074_vm7, %v8853_v15 }
 0x17a   : > { %7020 = vmatmul.mubr.msk.bf16.gmra.mrb[36].mxu1 %vm1074_vm7, %v8862_v36 }
 0x17b   : > { %7023 = vmatprep.mubr.msk.bf16.mxu1 %vm1074_vm7, %v8871_v41 }
 0x182   : > { %7024 = vmatmul.mubr.msk.bf16.gmra.mrb[40].mxu1 %vm1074_vm7, %v8896_v63 }
 0x183   : > { %7027 = vmatprep.mubr.msk.bf16.mxu1 %vm1074_vm7, %v8900_v18 }
 0x18a   : > { %7028 = vmatmul.mubr.msk.bf16.gmra.mrb[44].mxu1 %vm1074_vm7, %v8923_v12 }
 0x18b   : > { %7035 = vmatprep.mubr.msk.bf16.mxu1 %vm1074_vm7, %v9000_v31 }
 0x192   : > { %7036 = vmatmul.mubr.msk.bf16.vlgmr.msra.gmra.mrb[16].mxu1 %vm1074_vm7, %v9014_v59 }
 0x193   : > { %7068 = vmatpush3.bf16.msra.mxu1 %v8295_v39  ;;  %7039 = vmatprep.mubr.msk.bf16.mxu1 %vm1074_vm7, %v9019_v47  ;;  %v9036_v39 = vsel %vm1521_vm8, %v1534_v30, %v1535_v57  ;;  %v1549_v30 = vrot.slane %v8821_v9, 1 }
 0x194   : > { %7069 = vmatprep.subr.bf16.mxu1 %v8296_v28 }
 0x195   : > { %v9073_v57 = vsel %vm1521_vm8, %v1549_v30, %v1550_v6  ;;  %v1567_v6 = vrot.slane %v8923_v12, 1 }
 0x197   : > { %7070 = vmatpush3.bf16.msra.mxu1 %v8296_v28  ;;  %v9059_v28 = vsel %vm1521_vm8, %v1543_v26, %v1544_v58  ;;  %v9092_v26 = vsel %vm1521_vm8, %v1558_v19, %v1559_v43  ;;  %v1564_v58 = vrot.slane %v8900_v18, 1  ;;  %v9113_v21 = vsel %vm1521_vm8, %v1567_v6, %v1568_v11  ;;  %v8301_v19 = vld [vmem:[%s10222_s3 + $0x60] sm:$0xff]  }
 0x198   : > { %7103 = vmatprep.subr.bf16.mxu1 %v8297_v10 }
 0x199   : > { %v9106_v30 = vsel %vm1521_vm8, %v1564_v58, %v1565_v22 }
 0x19a   : > { %7040 = vmatmul.mubr.msk.bf16.gmra.mrb[20].mxu1 %vm1074_vm7, %v9031_v32 }
 0x19b   : > { %7043 = vmatprep.mubr.msk.bf16.mxu1 %vm1074_vm7, %v9036_v39 }
 0x1a2   : > { %7044 = vmatmul.mubr.msk.bf16.gmra.mrb[24].mxu1 %vm1074_vm7, %v9045_v37 }
 0x1a3   : > { %7047 = vmatprep.mubr.msk.bf16.mxu1 %vm1074_vm7, %v9050_v7 }
 0x1aa   : > { %7048 = vmatmul.mubr.msk.bf16.gmra.mrb[28].mxu1 %vm1074_vm7, %v9059_v28 }
 0x1ab   : > { %7051 = vmatprep.mubr.msk.bf16.mxu1 %vm1074_vm7, %v9064_v16 }
 0x1b2   : > { %7052 = vmatmul.mubr.msk.bf16.gmra.mrb[32].mxu1 %vm1074_vm7, %v9073_v57 }
 0x1b3   : > { %7055 = vmatprep.mubr.msk.bf16.mxu1 %vm1074_vm7, %v9078_v35 }
 0x1ba   : > { %7056 = vmatmul.mubr.msk.bf16.gmra.mrb[36].mxu1 %vm1074_vm7, %v9087_v1 }
 0x1bb   : > { %7059 = vmatprep.mubr.msk.bf16.mxu1 %vm1074_vm7, %v9092_v26 }
 0x1c2   : > { %7060 = vmatmul.mubr.msk.bf16.gmra.mrb[40].mxu1 %vm1074_vm7, %v9101_v54 }
 0x1c3   : > { %7063 = vmatprep.mubr.msk.bf16.mxu1 %vm1074_vm7, %v9106_v30 }
 0x1ca   : > { %7064 = vmatmul.mubr.msk.bf16.gmra.mrb[44].mxu1 %vm1074_vm7, %v9113_v21 }
 0x1cb   : > { %7071 = vmatprep.mubr.msk.bf16.mxu1 %vm1074_vm7, %v8646_v17  ;;  %v783_v17 = vshrl.u32 %v8867_v29, 16  ;;  %v8300_v29 = vld [vmem:[%s10222_s3 + $0x58] sm:$0xff]  }
 0x1d2   : > { %7072 = vmatmul.mubr.msk.bf16.vlgmr.msra.gmra.mrb[16].mxu1 %vm1074_vm7, %v8635_v13 }
 0x1d3   : > { %7104 = vmatpush3.bf16.msra.mxu1 %v8297_v10  ;;  %7075 = vmatprep.mubr.msk.bf16.mxu1 %vm1074_vm7, %v8707_v33  ;;  %v785_v10 = vrot.slane %v783_v17, 7 }
 0x1d4   : > { %7105 = vmatprep.subr.bf16.mxu1 %v8298_v51 }
 0x1d5   : > { %v788_v46 = vor.u32 %v786_v8, %v785_v10  ;;  %v859_v43 = vsel %vm8581_vm5, %v785_v10, 0  ;;  %v8304_v8 = vld [vmem:[%s10222_s3 + $0x78] sm:$0xff]  }
 0x1d6   : > { %v2048_v58 = vshll.u32 %v859_v43, 16  ;;  %v2268_v17 = vrot.slane %v859_v43, 1 }
 0x1d7   : > { %7106 = vmatpush3.bf16.msra.mxu1 %v8298_v51  ;;  %v9157_v23 = vsel %vm8581_vm5, 0, %v788_v46  ;;  %v8302_v51 = vld [vmem:[%s10222_s3 + $0x68] sm:$0xff]   ;;  %v8305_v46 = vld [vmem:[%s10222_s3 + $0x80] sm:$0xff]  }
 0x1d8   : > { %7139 = vmatprep.subr.bf16.mxu1 %v8299_v42  ;;  %v2041_v55 = vshrl.u32 %v9157_v23, 16  ;;  %v2050_v6 = vrot.slane %v2048_v58, 1 }
 0x1da   : > { %7076 = vmatmul.mubr.msk.bf16.gmra.mrb[20].mxu1 %vm1074_vm7, %v8717_v50 }
 0x1db   : > { %7079 = vmatprep.mubr.msk.bf16.mxu1 %vm1074_vm7, %v8753_v38 }
 0x1e2   : > { %7080 = vmatmul.mubr.msk.bf16.gmra.mrb[24].mxu1 %vm1074_vm7, %v8748_v27 }
 0x1e3   : > { %7083 = vmatprep.mubr.msk.bf16.mxu1 %vm1074_vm7, %v8779_v53 }
 0x1ea   : > { %7084 = vmatmul.mubr.msk.bf16.gmra.mrb[28].mxu1 %vm1074_vm7, %v8770_v48 }
 0x1eb   : > { %7087 = vmatprep.mubr.msk.bf16.mxu1 %vm1074_vm7, %v8821_v9 }
 0x1f2   : > { %7088 = vmatmul.mubr.msk.bf16.gmra.mrb[32].mxu1 %vm1074_vm7, %v8853_v15 }
 0x1f3   : > { %7091 = vmatprep.mubr.msk.bf16.mxu1 %vm1074_vm7, %v8862_v36 }
 0x1fa   : > { %7092 = vmatmul.mubr.msk.bf16.gmra.mrb[36].mxu1 %vm1074_vm7, %v8871_v41 }
 0x1fb   : > { %7095 = vmatprep.mubr.msk.bf16.mxu1 %vm1074_vm7, %v8896_v63 }
 0x202   : > { %7096 = vmatmul.mubr.msk.bf16.gmra.mrb[40].mxu1 %vm1074_vm7, %v8900_v18 }
 0x203   : > { %7099 = vmatprep.mubr.msk.bf16.mxu1 %vm1074_vm7, %v8923_v12 }
 0x20a   : > { %7100 = vmatmul.mubr.msk.bf16.gmra.mrb[44].mxu1 %vm1074_vm7, %v9157_v23 }
 0x20b   : > { %7107 = vmatprep.mubr.msk.bf16.mxu1 %vm1074_vm7, %v8672_v62  ;;  %v2043_v62 = vshll.u32 %v9157_v23, 16 }
 0x20d   : > { %v2045_v60 = vrot.slane %v2043_v62, 1 }
 0x20f   : > { %v2046_v22 = vor.u32 %v2045_v60, %v2041_v55 }
 0x211   : > { %v9202_v11 = vsel %vm864_vm6, %v2046_v22, %v2050_v6 }
 0x212   : > { %7108 = vmatmul.mubr.msk.bf16.vlgmr.msra.gmra.mrb[16].mxu1 %vm1074_vm7, %v8687_v20 }
 0x213   : > { %7140 = vmatpush3.bf16.msra.mxu1 %v8299_v42  ;;  %7111 = vmatprep.mubr.msk.bf16.mxu1 %vm1074_vm7, %v8765_v44  ;;  %v8303_v42 = vld [vmem:[%s10222_s3 + $0x70] sm:$0xff]  }
 0x214   : > { %7141 = vmatprep.subr.bf16.mxu1 %v8300_v29 }
 0x217   : > { %7142 = vmatpush3.bf16.msra.mxu1 %v8300_v29 }
 0x218   : > { %7175 = vmatprep.subr.bf16.mxu1 %v8301_v19 }
 0x21a   : > { %7112 = vmatmul.mubr.msk.bf16.gmra.mrb[20].mxu1 %vm1074_vm7, %v8792_v45 }
 0x21b   : > { %7115 = vmatprep.mubr.msk.bf16.mxu1 %vm1074_vm7, %v8801_v49 }
 0x222   : > { %7116 = vmatmul.mubr.msk.bf16.gmra.mrb[24].mxu1 %vm1074_vm7, %v8810_v2 }
 0x223   : > { %7119 = vmatprep.mubr.msk.bf16.mxu1 %vm1074_vm7, %v8841_v0 }
 0x22a   : > { %7120 = vmatmul.mubr.msk.bf16.gmra.mrb[28].mxu1 %vm1074_vm7, %v8865_v14 }
 0x22b   : > { %7123 = vmatprep.mubr.msk.bf16.mxu1 %vm1074_vm7, %v8888_v61 }
 0x232   : > { %7124 = vmatmul.mubr.msk.bf16.gmra.mrb[32].mxu1 %vm1074_vm7, %v8910_v40 }
 0x233   : > { %7127 = vmatprep.mubr.msk.bf16.mxu1 %vm1074_vm7, %v8926_v56 }
 0x23a   : > { %7128 = vmatmul.mubr.msk.bf16.gmra.mrb[36].mxu1 %vm1074_vm7, %v8932_v3 }
 0x23b   : > { %7131 = vmatprep.mubr.msk.bf16.mxu1 %vm1074_vm7, %v8944_v5 }
 0x242   : > { %7132 = vmatmul.mubr.msk.bf16.gmra.mrb[40].mxu1 %vm1074_vm7, %v8951_v52 }
 0x243   : > { %7135 = vmatprep.mubr.msk.bf16.mxu1 %vm1074_vm7, %v8956_v4 }
 0x24a   : > { %7136 = vmatmul.mubr.msk.bf16.gmra.mrb[44].mxu1 %vm1074_vm7, %v9202_v11 }
 0x24b   : > { %7143 = vmatprep.mubr.msk.bf16.mxu1 %vm1074_vm7, %v9014_v59  ;;  %v2267_v59 = vrot.slane %v9157_v23, 1 }
 0x24d   : > { %v9244_v10 = vsel %vm1521_vm8, %v2267_v59, %v2268_v17 }
 0x252   : > { %7144 = vmatmul.mubr.msk.bf16.vlgmr.msra.gmra.mrb[16].mxu1 %vm1074_vm7, %v9019_v47 }
 0x253   : > { %7176 = vmatpush3.bf16.msra.mxu1 %v8301_v19  ;;  %7147 = vmatprep.mubr.msk.bf16.mxu1 %vm1074_vm7, %v9031_v32 }
 0x254   : > { %7177 = vmatprep.subr.bf16.mxu1 %v8302_v51 }
 0x257   : > { %7178 = vmatpush3.bf16.msra.mxu1 %v8302_v51 }
 0x258   : > { %7211 = vmatprep.subr.bf16.mxu1 %v8303_v42 }
 0x25a   : > { %7148 = vmatmul.mubr.msk.bf16.gmra.mrb[20].mxu1 %vm1074_vm7, %v9036_v39 }
 0x25b   : > { %7151 = vmatprep.mubr.msk.bf16.mxu1 %vm1074_vm7, %v9045_v37 }
 0x262   : > { %7152 = vmatmul.mubr.msk.bf16.gmra.mrb[24].mxu1 %vm1074_vm7, %v9050_v7 }
 0x263   : > { %7155 = vmatprep.mubr.msk.bf16.mxu1 %vm1074_vm7, %v9059_v28 }
 0x26a   : > { %7156 = vmatmul.mubr.msk.bf16.gmra.mrb[28].mxu1 %vm1074_vm7, %v9064_v16 }
 0x26b   : > { %7159 = vmatprep.mubr.msk.bf16.mxu1 %vm1074_vm7, %v9073_v57 }
 0x272   : > { %7160 = vmatmul.mubr.msk.bf16.gmra.mrb[32].mxu1 %vm1074_vm7, %v9078_v35 }
 0x273   : > { %7163 = vmatprep.mubr.msk.bf16.mxu1 %vm1074_vm7, %v9087_v1 }
 0x27a   : > { %7164 = vmatmul.mubr.msk.bf16.gmra.mrb[36].mxu1 %vm1074_vm7, %v9092_v26 }
 0x27b   : > { %7167 = vmatprep.mubr.msk.bf16.mxu1 %vm1074_vm7, %v9101_v54 }
 0x282   : > { %7168 = vmatmul.mubr.msk.bf16.gmra.mrb[40].mxu1 %vm1074_vm7, %v9106_v30 }
 0x283   : > { %7171 = vmatprep.mubr.msk.bf16.mxu1 %vm1074_vm7, %v9113_v21 }
 0x28a   : > { %7172 = vmatmul.mubr.msk.bf16.gmra.mrb[44].mxu1 %vm1074_vm7, %v9244_v10 }
 0x28b   : > { %7179 = vmatprep.mubr.msk.bf16.mxu1 %vm1074_vm7, %v8635_v13  ;;  %v8307_v13 = vld [vmem:[%s10224_s5 + $0x40] sm:$0xff]  }
 0x28c   : > { %7283 = vmatprep.subr.bf16.mxu0 %v8307_v13 }
 0x28d   : > { %7284 = vmatpush3.bf16.msra.mxu0 %v8307_v13 }
 0x292   : > { %7180 = vmatmul.mubr.msk.bf16.vlgmr.msra.gmra.mrb[16].mxu1 %vm1074_vm7, %v8707_v33  ;;  %v8308_v33 = vld [vmem:[%s10224_s5 + $0x48] sm:$0xff]  }
 0x293   : > { %7212 = vmatpush3.bf16.msra.mxu1 %v8303_v42  ;;  %7183 = vmatprep.mubr.msk.bf16.mxu1 %vm1074_vm7, %v8717_v50  ;;  %v8309_v50 = vld [vmem:[%s10224_s5 + $0x50] sm:$0xff]  }
 0x294   : > { %7213 = vmatprep.subr.bf16.mxu1 %v8304_v8  ;;  %7285 = vmatprep.subr.bf16.mxu0 %v8308_v33 }
 0x295   : > { %7286 = vmatpush3.bf16.msra.mxu0 %v8308_v33 }
 0x296   : > { %7287 = vmatprep.subr.bf16.mxu0 %v8309_v50 }
 0x297   : > { %7214 = vmatpush3.bf16.msra.mxu1 %v8304_v8 }
 0x298   : > { %7247 = vmatprep.subr.bf16.mxu1 %v8305_v46 }
 0x299   : > { %7288 = vmatpush3.bf16.msra.mxu0 %v8309_v50 }
 0x29a   : > { %7184 = vmatmul.mubr.msk.bf16.gmra.mrb[20].mxu1 %vm1074_vm7, %v8753_v38  ;;  %v8311_v38 = vld [vmem:[%s10224_s5 + $0x60] sm:$0xff]  }
 0x29b   : > { %7187 = vmatprep.mubr.msk.bf16.mxu1 %vm1074_vm7, %v8748_v27  ;;  %v8306_v27 = vld [vmem:[%s10222_s3 + $0x88] sm:$0xff]  }
 0x2a2   : > { %7188 = vmatmul.mubr.msk.bf16.gmra.mrb[24].mxu1 %vm1074_vm7, %v8779_v53  ;;  %v8314_v53 = vld [vmem:[%s10224_s5 + $0x78] sm:$0xff]  }
 0x2a3   : > { %7191 = vmatprep.mubr.msk.bf16.mxu1 %vm1074_vm7, %v8770_v48  ;;  %v8313_v48 = vld [vmem:[%s10224_s5 + $0x70] sm:$0xff]  }
 0x2aa   : > { %7192 = vmatmul.mubr.msk.bf16.gmra.mrb[28].mxu1 %vm1074_vm7, %v8821_v9 }
 0x2ab   : > { %7195 = vmatprep.mubr.msk.bf16.mxu1 %vm1074_vm7, %v8853_v15 }
 0x2b2   : > { %7196 = vmatmul.mubr.msk.bf16.gmra.mrb[32].mxu1 %vm1074_vm7, %v8862_v36 }
 0x2b3   : > { %7199 = vmatprep.mubr.msk.bf16.mxu1 %vm1074_vm7, %v8871_v41 }
 0x2ba   : > { %7200 = vmatmul.mubr.msk.bf16.gmra.mrb[36].mxu1 %vm1074_vm7, %v8896_v63 }
 0x2bb   : > { %7203 = vmatprep.mubr.msk.bf16.mxu1 %vm1074_vm7, %v8900_v18 }
 0x2c2   : > { %7204 = vmatmul.mubr.msk.bf16.gmra.mrb[40].mxu1 %vm1074_vm7, %v8923_v12 }
 0x2c3   : > { %7207 = vmatprep.mubr.msk.bf16.mxu1 %vm1074_vm7, %v9157_v23 }
 0x2ca   : > { %7208 = vmatmul.mubr.msk.bf16.gmra.mrb[44].mxu1 %vm1074_vm7, %v8587_v25 }
 0x2cb   : > { %7215 = vmatprep.mubr.msk.bf16.mxu1 %vm1074_vm7, %v8687_v20  ;;  %v8310_v20 = vld [vmem:[%s10224_s5 + $0x58] sm:$0xff]  }
 0x2cc   : > { %7289 = vmatprep.subr.bf16.mxu0 %v8310_v20 }
 0x2cd   : > { %7290 = vmatpush3.bf16.msra.mxu0 %v8310_v20 }
 0x2ce   : > { %7291 = vmatprep.subr.bf16.mxu0 %v8311_v38 }
 0x2d1   : > { %7292 = vmatpush3.bf16.msra.mxu0 %v8311_v38 }
 0x2d2   : > { %7216 = vmatmul.mubr.msk.bf16.vlgmr.msra.gmra.mrb[16].mxu1 %vm1074_vm7, %v8765_v44  ;;  %v8312_v44 = vld [vmem:[%s10224_s5 + $0x68] sm:$0xff]  }
 0x2d3   : > { %7248 = vmatpush3.bf16.msra.mxu1 %v8305_v46  ;;  %7219 = vmatprep.mubr.msk.bf16.mxu1 %vm1074_vm7, %v8792_v45  ;;  %v9380_v45 = vld [vmem:[%s10224_s5] sm:$0xff]  }
 0x2d4   : > { %7249 = vmatprep.subr.bf16.mxu1 %v8306_v27  ;;  %7293 = vmatprep.subr.bf16.mxu0 %v8312_v44 }
 0x2d5   : > { %7294 = vmatpush3.bf16.msra.mxu0 %v8312_v44 }
 0x2d6   : > { %7295 = vmatprep.subr.bf16.mxu0 %v8313_v48 }
 0x2d7   : > { %7250 = vmatpush3.bf16.msra.mxu1 %v8306_v27 }
 0x2d9   : > { %7296 = vmatpush3.bf16.msra.mxu0 %v8313_v48 }
 0x2da   : > { %7220 = vmatmul.mubr.msk.bf16.gmra.mrb[20].mxu1 %vm1074_vm7, %v8801_v49  ;;  %7297 = vmatprep.subr.bf16.mxu0 %v8314_v53  ;;  %v9386_v49 = vld [vmem:[%s10223_s4] ss:$0 sm:$0xff] }
 0x2db   : > { %7223 = vmatprep.mubr.msk.bf16.mxu1 %vm1074_vm7, %v8810_v2 }
 0x2dd   : > { %7298 = vmatpush3.bf16.msra.mxu0 %v8314_v53 }
 0x2de   : > { %7331 = vmatprep.subr.bf16.mxu0 %v9380_v45 }
 0x2e2   : > { %7224 = vmatmul.mubr.msk.bf16.gmra.mrb[24].mxu1 %vm1074_vm7, %v8841_v0 }
 0x2e3   : > { %7227 = vmatprep.mubr.msk.bf16.mxu1 %vm1074_vm7, %v8865_v14 }
 0x2ea   : > { %7228 = vmatmul.mubr.msk.bf16.gmra.mrb[28].mxu1 %vm1074_vm7, %v8888_v61 }
 0x2eb   : > { %7231 = vmatprep.mubr.msk.bf16.mxu1 %vm1074_vm7, %v8910_v40 }
 0x2f2   : > { %7232 = vmatmul.mubr.msk.bf16.gmra.mrb[32].mxu1 %vm1074_vm7, %v8926_v56 }
 0x2f3   : > { %7235 = vmatprep.mubr.msk.bf16.mxu1 %vm1074_vm7, %v8932_v3 }
 0x2fa   : > { %7236 = vmatmul.mubr.msk.bf16.gmra.mrb[36].mxu1 %vm1074_vm7, %v8944_v5 }
 0x2fb   : > { %7239 = vmatprep.mubr.msk.bf16.mxu1 %vm1074_vm7, %v8951_v52 }
 0x302   : > { %7240 = vmatmul.mubr.msk.bf16.gmra.mrb[40].mxu1 %vm1074_vm7, %v8956_v4 }
 0x303   : > { %7243 = vmatprep.mubr.msk.bf16.mxu1 %vm1074_vm7, %v9202_v11 }
 0x30a   : > { %7244 = vmatmul.mubr.msk.bf16.gmra.mrb[44].mxu1 %vm1074_vm7, %v8600_v34 }
 0x30b   : > { %7251 = vmatprep.mubr.msk.bf16.mxu1 %vm1074_vm7, %v9019_v47 }
 0x312   : > { %7252 = vmatmul.mubr.msk.bf16.vlgmr.msra.gmra.mrb[16].mxu1 %vm1074_vm7, %v9031_v32 }
 0x313   : > { %7255 = vmatprep.mubr.msk.bf16.mxu1 %vm1074_vm7, %v9036_v39 }
 0x31a   : > { %7256 = vmatmul.mubr.msk.bf16.gmra.mrb[20].mxu1 %vm1074_vm7, %v9045_v37 }
 0x31b   : > { %7259 = vmatprep.mubr.msk.bf16.mxu1 %vm1074_vm7, %v9050_v7 }
 0x322   : > { %7260 = vmatmul.mubr.msk.bf16.gmra.mrb[24].mxu1 %vm1074_vm7, %v9059_v28 }
 0x323   : > { %7263 = vmatprep.mubr.msk.bf16.mxu1 %vm1074_vm7, %v9064_v16 }
 0x32a   : > { %7264 = vmatmul.mubr.msk.bf16.gmra.mrb[28].mxu1 %vm1074_vm7, %v9073_v57 }
 0x32b   : > { %7267 = vmatprep.mubr.msk.bf16.mxu1 %vm1074_vm7, %v9078_v35 }
 0x332   : > { %7268 = vmatmul.mubr.msk.bf16.gmra.mrb[32].mxu1 %vm1074_vm7, %v9087_v1 }
 0x333   : > { %7271 = vmatprep.mubr.msk.bf16.mxu1 %vm1074_vm7, %v9092_v26 }
 0x33a   : > { %7272 = vmatmul.mubr.msk.bf16.gmra.mrb[36].mxu1 %vm1074_vm7, %v9101_v54 }
 0x33b   : > { %7275 = vmatprep.mubr.msk.bf16.mxu1 %vm1074_vm7, %v9106_v30 }
 0x342   : > { %7276 = vmatmul.mubr.msk.bf16.gmra.mrb[40].mxu1 %vm1074_vm7, %v9113_v21 }
 0x343   : > { %7279 = vmatprep.mubr.msk.bf16.mxu1 %vm1074_vm7, %v9244_v10 }
 0x34a   : > { %7280 = vmatmul.mubr.msk.bf16.gmra.mrb[44].mxu1 %vm1074_vm7, %v9000_v31 }
 0x3e5   : > { %v7253_v2 = vpop.f32.mrb[16].mxu1 }
 0x3e6   : > { %v3121_v9 = vadd.f32 %v7253_v2, %v9386_v49  ;;  %v2954_v0 = vpop.f32.mrb[17].mxu1 }
 0x3e7   : > { %v3119_v15 = vadd.f32 %v9386_v49, %v2954_v0  ;;  %v7254_v36 = vpop.f32.mrb[18].mxu1 }
 0x3e8   : > { %v3122_v14 = vadd.f32 %v7254_v36, %v9386_v49  ;;  %v2957_v41 = vpop.f32.mrb[19].mxu1  ;;  %v3153_v63 = vmax.f32 %v3121_v9, 0.0 }
 0x3e9   : > { %v3120_v61 = vadd.f32 %v9386_v49, %v2957_v41  ;;  %v3151_v40 = vmax.f32 %v3119_v15, 0.0 }
 0x3ea   : > { %v3154_v18 = vmax.f32 %v3122_v14, 0.0 }
 0x3eb   : > { %v3152_v12 = vmax.f32 %v3120_v61, 0.0 }
 0x3ec   : > { %v3184_v56 = vpack.c.bf16 %v3154_v18, %v3153_v63 }
 0x3ed   : > { %v3183_v3 = vpack.c.bf16 %v3152_v12, %v3151_v40  ;;  %v7257_v5 = vpop.f32.mrb[20].mxu1 }
 0x3ee   : > { %v3208_v52 = vshrl.u32 %v3184_v56, 16  ;;  %v3125_v4 = vadd.f32 %v7257_v5, %v9386_v49  ;;  %v2970_v47 = vpop.f32.mrb[21].mxu1  ;;  %v3211_v28 = vshll.u32 %v3184_v56, 16 }
 0x3ef   : > { %v3201_v32 = vshrl.u32 %v3183_v3, 16  ;;  %v3123_v39 = vadd.f32 %v9386_v49, %v2970_v47  ;;  %v7258_v37 = vpop.f32.mrb[22].mxu1  ;;  %v3204_v1 = vshll.u32 %v3183_v3, 16 }
 0x3f0   : > { %v3210_v7 = vrot.slane %v3208_v52, 7  ;;  %v3126_v16 = vadd.f32 %v7258_v37, %v9386_v49  ;;  %v2973_v57 = vpop.f32.mrb[23].mxu1  ;;  %v3157_v30 = vmax.f32 %v3125_v4, 0.0  ;;  %v8316_v37 = vld [vmem:[%s10224_s5 + $0x8] sm:$0xff]  }
 0x3f1   : > { %v3203_v35 = vrot.slane %v3201_v32, 7  ;;  %v3124_v26 = vadd.f32 %v9386_v49, %v2973_v57  ;;  %v3155_v21 = vmax.f32 %v3123_v39, 0.0 }
 0x3f2   : > { %v3213_v54 = vor.u32 %v3211_v28, %v3210_v7  ;;  %v3158_v23 = vmax.f32 %v3126_v16, 0.0  ;;  %v9398_v29 = vsel %vm8581_vm5, %v3210_v7, 0 }
 0x3f3   : > { %v3206_v19 = vor.u32 %v3204_v1, %v3203_v35  ;;  %v9402_v62 = vsel %vm8581_vm5, %v3203_v35, 0  ;;  %v3156_v43 = vmax.f32 %v3124_v26, 0.0  ;;  %v3412_v10 = vshll.u32 %v9398_v29, 16 }
 0x3f4   : > { %v9406_v55 = vsel %vm8581_vm5, 0, %v3213_v54  ;;  %v3186_v60 = vpack.c.bf16 %v3158_v23, %v3157_v30  ;;  %v3400_v51 = vshll.u32 %v9402_v62, 16 }
 0x3f5   : > { %v9410_v58 = vsel %vm8581_vm5, 0, %v3206_v19  ;;  %v3185_v22 = vpack.c.bf16 %v3156_v43, %v3155_v21  ;;  %v7261_v6 = vpop.f32.mrb[24].mxu1  ;;  %v3407_v11 = vshll.u32 %v9406_v55, 16  ;;  %v3405_v50 = vshrl.u32 %v9406_v55, 16 }
 0x3f6   : > { %v3222_v42 = vshrl.u32 %v3186_v60, 16  ;;  %v3129_v59 = vadd.f32 %v7261_v6, %v9386_v49  ;;  %v2986_v17 = vpop.f32.mrb[25].mxu1  ;;  %v3225_v8 = vshll.u32 %v3186_v60, 16  ;;  %v3395_v48 = vshll.u32 %v9410_v58, 16 }
 0x3f7   : > { %v3215_v46 = vshrl.u32 %v3185_v22, 16  ;;  %v3127_v13 = vadd.f32 %v9386_v49, %v2986_v17  ;;  %v7262_v33 = vpop.f32.mrb[26].mxu1  ;;  %v3218_v20 = vshll.u32 %v3185_v22, 16  ;;  %v3393_v9 = vshrl.u32 %v9410_v58, 16 }
 0x3f8   : > { %v3224_v27 = vrot.slane %v3222_v42, 7  ;;  %v3130_v38 = vadd.f32 %v7262_v33, %v9386_v49  ;;  %v2989_v44 = vpop.f32.mrb[27].mxu1  ;;  %v3409_v0 = vrot.slane %v3407_v11, 1  ;;  %v3161_v36 = vmax.f32 %v3129_v59, 0.0  ;;  %v8317_v59 = vld [vmem:[%s10224_s5 + $0x10] sm:$0xff]  }
 0x3f9   : > { %v3217_v53 = vrot.slane %v3215_v46, 7  ;;  %v3128_v2 = vadd.f32 %v9386_v49, %v2989_v44  ;;  %v3397_v41 = vrot.slane %v3395_v48, 1  ;;  %v3159_v63 = vmax.f32 %v3127_v13, 0.0 }
 0x3fa   : > { %v3227_v15 = vor.u32 %v3225_v8, %v3224_v27  ;;  %v3162_v14 = vmax.f32 %v3130_v38, 0.0  ;;  %v3410_v40 = vor.u32 %v3409_v0, %v3405_v50  ;;  %v3402_v12 = vrot.slane %v3400_v51, 1 }
 0x3fb   : > { %v3220_v61 = vor.u32 %v3218_v20, %v3217_v53  ;;  %v3160_v18 = vmax.f32 %v3128_v2, 0.0  ;;  %v9424_v56 = vsel %vm8581_vm5, %v3217_v53, 0  ;;  %v3398_v5 = vor.u32 %v3397_v41, %v3393_v9 }
 0x3fc   : > { %v3188_v3 = vpack.c.bf16 %v3162_v14, %v3161_v36  ;;  %v9428_v52 = vsel %vm8581_vm5, 0, %v3227_v15  ;;  %v9432_v4 = vsel %vm8581_vm5, %v3224_v27, 0  ;;  %v3414_v39 = vrot.slane %v3412_v10, 1 }
 0x3fd   : > { %v3187_v47 = vpack.c.bf16 %v3160_v18, %v3159_v63  ;;  %v7265_v32 = vpop.f32.mrb[28].mxu1  ;;  %v9439_v7 = vsel %vm8581_vm5, 0, %v3220_v61  ;;  %v9443_v57 = vsel %vm864_vm6, %v3398_v5, %v3402_v12  ;;  %v3424_v21 = vshll.u32 %v9424_v56, 16  ;;  %v8318_v63 = vld [vmem:[%s10224_s5 + $0x18] sm:$0xff]  }
 0x3fe   : > { %v3236_v28 = vshrl.u32 %v3188_v3, 16  ;;  %v3133_v16 = vadd.f32 %v7265_v32, %v9386_v49  ;;  %v3002_v35 = vpop.f32.mrb[29].mxu1  ;;  %7300 = vmatmul.mubr.bf16.vlgmr.msra.gmra.mrb[16].mxu0 %v9443_v57  ;;  %v9448_v54 = vsel %vm864_vm6, %v3410_v40, %v3414_v39  ;;  %v3239_v19 = vshll.u32 %v3188_v3, 16 }
 0x3ff   : > { %v3229_v1 = vshrl.u32 %v3187_v47, 16  ;;  %v3131_v26 = vadd.f32 %v9386_v49, %v3002_v35  ;;  %v7266_v30 = vpop.f32.mrb[30].mxu1  ;;  %7332 = vmatpush3.bf16.msra.mxu0 %v9380_v45  ;;  %7303 = vmatprep.mubr.bf16.mxu0 %v9448_v54  ;;  %v3429_v22 = vshrl.u32 %v9428_v52, 16  ;;  %v3232_v11 = vshll.u32 %v3187_v47, 16 }
 0x400   : > { %v3238_v23 = vrot.slane %v3236_v28, 7  ;;  %v3134_v43 = vadd.f32 %v7266_v30, %v9386_v49  ;;  %v3005_v60 = vpop.f32.mrb[31].mxu1  ;;  %7333 = vmatprep.subr.bf16.mxu0 %v8316_v37  ;;  %v3419_v42 = vshll.u32 %v9439_v7, 16  ;;  %v3165_v45 = vmax.f32 %v3133_v16, 0.0 }
 0x401   : > { %v3231_v6 = vrot.slane %v3229_v1, 7  ;;  %v3132_v51 = vadd.f32 %v9386_v49, %v3005_v60  ;;  %v3417_v8 = vshrl.u32 %v9439_v7, 16  ;;  %v3163_v13 = vmax.f32 %v3131_v26, 0.0 }
 0x402   : > { %v3241_v17 = vor.u32 %v3239_v19, %v3238_v23  ;;  %v3166_v10 = vmax.f32 %v3134_v43, 0.0  ;;  %v3421_v50 = vrot.slane %v3419_v42, 1  ;;  %v9463_v27 = vsel %vm8581_vm5, %v3238_v23, 0  ;;  %v8319_v43 = vld [vmem:[%s10224_s5 + $0x20] sm:$0xff]  }
 0x403   : > { %v3234_v46 = vor.u32 %v3232_v11, %v3231_v6  ;;  %v3164_v33 = vmax.f32 %v3132_v51, 0.0  ;;  %7334 = vmatpush3.bf16.msra.mxu0 %v8316_v37  ;;  %v3431_v38 = vshll.u32 %v9428_v52, 16  ;;  %v3436_v44 = vshll.u32 %v9432_v4, 16 }
 0x404   : > { %v3190_v20 = vpack.c.bf16 %v3166_v10, %v3165_v45  ;;  %v9469_v48 = vsel %vm8581_vm5, %v3231_v6, 0  ;;  %v3422_v9 = vor.u32 %v3421_v50, %v3417_v8  ;;  %v3426_v0 = vrot.slane %v3424_v21, 1  ;;  %7335 = vmatprep.subr.bf16.mxu0 %v8317_v59 }
 0x405   : > { %v3189_v53 = vpack.c.bf16 %v3164_v33, %v3163_v13  ;;  %v7269_v2 = vpop.f32.mrb[32].mxu1  ;;  %v9473_v15 = vsel %vm8581_vm5, 0, %v3241_v17  ;;  %v3433_v61 = vrot.slane %v3431_v38, 1  ;;  %v9481_v18 = vsel %vm8581_vm5, 0, %v3234_v46 }
 0x406   : > { %v3250_v36 = vshrl.u32 %v3190_v20, 16  ;;  %v3137_v14 = vadd.f32 %v7269_v2, %v9386_v49  ;;  %v3018_v41 = vpop.f32.mrb[33].mxu1  ;;  %v9484_v12 = vsel %vm864_vm6, %v3422_v9, %v3426_v0  ;;  %v3253_v32 = vshll.u32 %v3190_v20, 16 }
 0x407   : > { %v3243_v40 = vshrl.u32 %v3189_v53, 16  ;;  %v3135_v3 = vadd.f32 %v9386_v49, %v3018_v41  ;;  %v7270_v5 = vpop.f32.mrb[34].mxu1  ;;  %7304 = vmatmul.mubr.bf16.gmra.mrb[20].mxu0 %v9484_v12  ;;  %v3434_v39 = vor.u32 %v3433_v61, %v3429_v22  ;;  %v3438_v37 = vrot.slane %v3436_v44, 1 }
 0x408   : > { %v3252_v47 = vrot.slane %v3250_v36, 7  ;;  %v3021_v28 = vpop.f32.mrb[35].mxu1  ;;  %v3246_v35 = vshll.u32 %v3189_v53, 16  ;;  %v3138_v1 = vadd.f32 %v7270_v5, %v9386_v49  ;;  %7336 = vmatpush3.bf16.msra.mxu0 %v8317_v59  ;;  %v3169_v21 = vmax.f32 %v3137_v14, 0.0  ;;  %v8320_v53 = vld [vmem:[%s10224_s5 + $0x28] sm:$0xff]  }
 0x409   : > { %v3245_v16 = vrot.slane %v3243_v40, 7  ;;  %v3136_v26 = vadd.f32 %v9386_v49, %v3021_v28  ;;  %v9491_v23 = vsel %vm864_vm6, %v3434_v39, %v3438_v37  ;;  %v3448_v19 = vshll.u32 %v9469_v48, 16  ;;  %7337 = vmatprep.subr.bf16.mxu0 %v8318_v63 }
 0x40a   : > { %v3255_v30 = vor.u32 %v3253_v32, %v3252_v47  ;;  %v3167_v22 = vmax.f32 %v3135_v3, 0.0  ;;  %7307 = vmatprep.mubr.bf16.mxu0 %v9491_v23  ;;  %v3170_v6 = vmax.f32 %v3138_v1, 0.0  ;;  %v9500_v51 = vsel %vm8581_vm5, %v3252_v47, 0  ;;  %v8321_v1 = vld [vmem:[%s10224_s5 + $0x30] sm:$0xff]  }
 0x40b   : > { %v3248_v60 = vor.u32 %v3246_v35, %v3245_v16  ;;  %v3168_v11 = vmax.f32 %v3136_v26, 0.0  ;;  %v9504_v42 = vsel %vm8581_vm5, %v3245_v16, 0  ;;  %v3441_v59 = vshrl.u32 %v9481_v18, 16 }
 0x40c   : > { %v3443_v17 = vshll.u32 %v9481_v18, 16  ;;  %v9510_v45 = vsel %vm8581_vm5, 0, %v3255_v30  ;;  %v3192_v10 = vpack.c.bf16 %v3170_v6, %v3169_v21  ;;  %v3455_v13 = vshll.u32 %v9473_v15, 16  ;;  %7338 = vmatpush3.bf16.msra.mxu0 %v8318_v63 }
 0x40d   : > { %v3191_v8 = vpack.c.bf16 %v3168_v11, %v3167_v22  ;;  %v7273_v46 = vpop.f32.mrb[36].mxu1  ;;  %v3450_v50 = vrot.slane %v3448_v19, 1  ;;  %v3453_v38 = vshrl.u32 %v9473_v15, 16  ;;  %v3460_v44 = vshll.u32 %v9463_v27, 16  ;;  %7339 = vmatprep.subr.bf16.mxu0 %v8319_v43 }
 0x40e   : > { %v3445_v33 = vrot.slane %v3443_v17, 1  ;;  %v3034_v20 = vpop.f32.mrb[37].mxu1  ;;  %v9520_v2 = vsel %vm8581_vm5, 0, %v3248_v60  ;;  %v3264_v9 = vshrl.u32 %v3192_v10, 16  ;;  %v3141_v36 = vadd.f32 %v7273_v46, %v9386_v49 }
 0x40f   : > { %v3257_v0 = vshrl.u32 %v3191_v8, 16  ;;  %v7274_v14 = vpop.f32.mrb[38].mxu1  ;;  %v3267_v41 = vshll.u32 %v3192_v10, 16  ;;  %v3139_v63 = vadd.f32 %v9386_v49, %v3034_v20  ;;  %v3457_v40 = vrot.slane %v3455_v13, 1 }
 0x410   : > { %v3446_v61 = vor.u32 %v3445_v33, %v3441_v59  ;;  %v3037_v3 = vpop.f32.mrb[39].mxu1  ;;  %v3266_v5 = vrot.slane %v3264_v9, 7  ;;  %v3260_v32 = vshll.u32 %v3191_v8, 16  ;;  %v3142_v39 = vadd.f32 %v7274_v14, %v9386_v49  ;;  %7340 = vmatpush3.bf16.msra.mxu0 %v8319_v43 }
 0x411   : > { %v3259_v47 = vrot.slane %v3257_v0, 7  ;;  %v3458_v28 = vor.u32 %v3457_v40, %v3453_v38  ;;  %v3462_v16 = vrot.slane %v3460_v44, 1  ;;  %v3140_v35 = vadd.f32 %v9386_v49, %v3037_v3  ;;  %7341 = vmatprep.subr.bf16.mxu0 %v8320_v53  ;;  %v8322_v38 = vld [vmem:[%s10224_s5 + $0x38] sm:$0xff]  }
 0x412   : > { %v9526_v37 = vsel %vm864_vm6, %v3446_v61, %v3450_v50  ;;  %v3269_v26 = vor.u32 %v3267_v41, %v3266_v5  ;;  %v3173_v21 = vmax.f32 %v3141_v36, 0.0  ;;  %v3171_v19 = vmax.f32 %v3139_v63, 0.0 }
 0x413   : > { %v3262_v30 = vor.u32 %v3260_v32, %v3259_v47  ;;  %7308 = vmatmul.mubr.bf16.gmra.mrb[24].mxu0 %v9526_v37  ;;  %v9534_v43 = vsel %vm864_vm6, %v3458_v28, %v3462_v16  ;;  %v3174_v60 = vmax.f32 %v3142_v39, 0.0  ;;  %v3172_v22 = vmax.f32 %v3140_v35, 0.0 }
 0x414   : > { %v3467_v6 = vshll.u32 %v9520_v2, 16  ;;  %v9539_v11 = vsel %vm8581_vm5, %v3266_v5, 0  ;;  %v9543_v59 = vsel %vm8581_vm5, %v3259_v47, 0  ;;  %7311 = vmatprep.mubr.bf16.mxu0 %v9534_v43  ;;  %v3465_v10 = vshrl.u32 %v9520_v2, 16  ;;  %7342 = vmatpush3.bf16.msra.mxu0 %v8320_v53 }
 0x415   : > { %v7277_v17 = vpop.f32.mrb[40].mxu1  ;;  %v3472_v8 = vshll.u32 %v9504_v42, 16  ;;  %v9550_v46 = vsel %vm8581_vm5, 0, %v3269_v26  ;;  %v3194_v13 = vpack.c.bf16 %v3174_v60, %v3173_v21  ;;  %v3193_v33 = vpack.c.bf16 %v3172_v22, %v3171_v19  ;;  %7343 = vmatprep.subr.bf16.mxu0 %v8321_v1  ;;  %v9568_v26 = vld [vmem:[%s10224_s5 + $0x80] sm:$0xff]  }
 0x416   : > { %v3469_v50 = vrot.slane %v3467_v6, 1  ;;  %v3050_v20 = vpop.f32.mrb[41].mxu1  ;;  %v9557_v44 = vsel %vm8581_vm5, 0, %v3262_v30  ;;  %v3477_v9 = vshrl.u32 %v9510_v45, 16  ;;  %v3479_v53 = vshll.u32 %v9510_v45, 16 }
 0x417   : > { %v3484_v0 = vshll.u32 %v9500_v51, 16  ;;  %v7278_v36 = vpop.f32.mrb[42].mxu1  ;;  %v3278_v14 = vshrl.u32 %v3194_v13, 16  ;;  %v3271_v41 = vshrl.u32 %v3193_v33, 16  ;;  %v3145_v61 = vadd.f32 %v7277_v17, %v9386_v49 }
 0x418   : > { %v3143_v63 = vadd.f32 %v9386_v49, %v3050_v20  ;;  %v3053_v40 = vpop.f32.mrb[43].mxu1  ;;  %v3281_v3 = vshll.u32 %v3194_v13, 16  ;;  %v3470_v5 = vor.u32 %v3469_v50, %v3465_v10  ;;  %v3474_v47 = vrot.slane %v3472_v8, 1  ;;  %7344 = vmatpush3.bf16.msra.mxu0 %v8321_v1 }
 0x419   : > { %v3481_v32 = vrot.slane %v3479_v53, 1  ;;  %v3280_v39 = vrot.slane %v3278_v14, 7  ;;  %v3273_v28 = vrot.slane %v3271_v41, 7  ;;  %v3274_v16 = vshll.u32 %v3193_v33, 16  ;;  %7345 = vmatprep.subr.bf16.mxu0 %v8322_v38 }
 0x41a   : > { %v3146_v35 = vadd.f32 %v7278_v36, %v9386_v49  ;;  %v9571_v30 = vsel %vm864_vm6, %v3470_v5, %v3474_v47  ;;  %v3486_v19 = vrot.slane %v3484_v0, 1  ;;  %v3144_v60 = vadd.f32 %v9386_v49, %v3053_v40 }
 0x41b   : > { %v3482_v21 = vor.u32 %v3481_v32, %v3477_v9  ;;  %v3276_v22 = vor.u32 %v3274_v16, %v3273_v28  ;;  %v3177_v1 = vmax.f32 %v3145_v61, 0.0  ;;  %7312 = vmatmul.mubr.bf16.gmra.mrb[28].mxu0 %v9571_v30  ;;  %v3175_v6 = vmax.f32 %v3143_v63, 0.0 }
 0x41c   : > { %v3489_v17 = vshrl.u32 %v9557_v44, 16  ;;  %v3178_v8 = vmax.f32 %v3146_v35, 0.0  ;;  %v3176_v13 = vmax.f32 %v3144_v60, 0.0  ;;  %v3491_v50 = vshll.u32 %v9557_v44, 16  ;;  %7346 = vmatpush3.bf16.msra.mxu0 %v8322_v38 }
 0x41d   : > { %v9577_v10 = vsel %vm864_vm6, %v3482_v21, %v3486_v19  ;;  %v7281_v33 = vpop.f32.mrb[44].mxu1  ;;  %v3283_v20 = vor.u32 %v3281_v3, %v3280_v39  ;;  %v9582_v9 = vsel %vm8581_vm5, %v3280_v39, 0  ;;  %v3496_v0 = vshll.u32 %v9543_v59, 16  ;;  %7379 = vmatprep.subr.bf16.mxu0 %v9568_v26 }
 0x41e   : > { %7315 = vmatprep.mubr.bf16.mxu0 %v9577_v10  ;;  %v3149_v53 = vadd.f32 %v7281_v33, %v9386_v49  ;;  %v3066_v36 = vpop.f32.mrb[45].mxu1  ;;  %v9590_v14 = vsel %vm8581_vm5, %v3273_v28, 0  ;;  %v3196_v41 = vpack.c.bf16 %v3178_v8, %v3177_v1  ;;  %v3195_v38 = vpack.c.bf16 %v3176_v13, %v3175_v6 }
 0x41f   : > { %v3493_v61 = vrot.slane %v3491_v50, 1  ;;  %v7282_v63 = vpop.f32.mrb[46].mxu1  ;;  %v9594_v40 = vsel %vm8581_vm5, 0, %v3276_v22  ;;  %v3498_v3 = vrot.slane %v3496_v0, 1  ;;  %v3147_v5 = vadd.f32 %v9386_v49, %v3066_v36 }
 0x420   : > { %v3503_v47 = vshll.u32 %v9550_v46, 16  ;;  %v3069_v32 = vpop.f32.mrb[47].mxu1  ;;  %v3292_v39 = vshrl.u32 %v3196_v41, 16  ;;  %v3295_v16 = vshll.u32 %v3196_v41, 16  ;;  %v3285_v35 = vshrl.u32 %v3195_v38, 16 }
 0x421   : > { %v3501_v28 = vshrl.u32 %v9550_v46, 16  ;;  %v3288_v21 = vshll.u32 %v3195_v38, 16  ;;  %v3494_v19 = vor.u32 %v3493_v61, %v3489_v17  ;;  %v3508_v1 = vshll.u32 %v9539_v11, 16 }
 0x422   : > { %v3505_v60 = vrot.slane %v3503_v47, 1  ;;  %v3294_v6 = vrot.slane %v3292_v39, 7  ;;  %v3287_v8 = vrot.slane %v3285_v35, 7  ;;  %v3150_v22 = vadd.f32 %v7282_v63, %v9386_v49 }
 0x423   : > { %v3148_v13 = vadd.f32 %v9386_v49, %v3069_v32  ;;  %v9604_v33 = vsel %vm8581_vm5, 0, %v3283_v20  ;;  %v9607_v50 = vsel %vm864_vm6, %v3494_v19, %v3498_v3  ;;  %v3510_v36 = vrot.slane %v3508_v1, 1 }
 0x424   : > { %v3506_v0 = vor.u32 %v3505_v60, %v3501_v28  ;;  %v3297_v41 = vor.u32 %v3295_v16, %v3294_v6  ;;  %v3290_v17 = vor.u32 %v3288_v21, %v3287_v8  ;;  %v3181_v38 = vmax.f32 %v3149_v53, 0.0  ;;  %7316 = vmatmul.mubr.bf16.gmra.mrb[32].mxu0 %v9607_v50 }
 0x425   : > { %v3179_v61 = vmax.f32 %v3147_v5, 0.0  ;;  %v3182_v63 = vmax.f32 %v3150_v22, 0.0  ;;  %v3180_v49 = vmax.f32 %v3148_v13, 0.0  ;;  %v3515_v32 = vshll.u32 %v9594_v40, 16 }
 0x426   : > { %v9611_v47 = vsel %vm864_vm6, %v3506_v0, %v3510_v36  ;;  %v9616_v20 = vsel %vm8581_vm5, 0, %v3290_v17  ;;  %v3520_v3 = vshll.u32 %v9590_v14, 16  ;;  %v3527_v5 = vshll.u32 %v9604_v33, 16 }
 0x427   : > { %10235 = vst [vmem:[#allocation6_spill] sm:$0xff] %v9611_v47  ;;  %7319 = vmatprep.mubr.bf16.mxu0 %v9611_v47  ;;  %v9620_v39 = vpack.c.bf16 %v3182_v63, %v3181_v38  ;;  %v3197_v53 = vpack.c.bf16 %v3180_v49, %v3179_v61  ;;  %v3517_v16 = vrot.slane %v3515_v32, 1  ;;  %v9625_v35 = vsel %vm8581_vm5, %v3294_v6, 0 }
 0x428   : > { %v3513_v28 = vshrl.u32 %v9594_v40, 16  ;;  %v3532_v21 = vshll.u32 %v9582_v9, 16  ;;  %v3539_v19 = vshll.u32 %v9616_v20, 16  ;;  %v9632_v60 = vsel %vm8581_vm5, 0, %v3297_v41 }
 0x429   : > { %v9636_v1 = vsel %vm8581_vm5, %v3287_v8, 0  ;;  %v3299_v22 = vshrl.u32 %v3197_v53, 16  ;;  %v3525_v13 = vshrl.u32 %v9604_v33, 16  ;;  %v3522_v6 = vrot.slane %v3520_v3, 1 }
 0x42a   : > { %v3518_v0 = vor.u32 %v3517_v16, %v3513_v28  ;;  %v3529_v36 = vrot.slane %v3527_v5, 1  ;;  %v3541_v17 = vrot.slane %v3539_v19, 1  ;;  %v3302_v61 = vshll.u32 %v3197_v53, 16 }
 0x42b   : > { %v3301_v38 = vrot.slane %v3299_v22, 7  ;;  %v3534_v63 = vrot.slane %v3532_v21, 1  ;;  %v3537_v49 = vshrl.u32 %v9616_v20, 16  ;;  %v3544_v34 = vshll.u32 %v9636_v1, 16 }
 0x42c   : > { %v9641_v32 = vsel %vm864_vm6, %v3518_v0, %v3522_v6  ;;  %v3530_v41 = vor.u32 %v3529_v36, %v3525_v13  ;;  %v3551_v8 = vshll.u32 %v9632_v60, 16  ;;  %v3549_v28 = vshrl.u32 %v9632_v60, 16 }
 0x42d   : > { %v3304_v47 = vor.u32 %v3302_v61, %v3301_v38  ;;  %7320 = vmatmul.mubr.bf16.gmra.mrb[36].mxu0 %v9641_v32  ;;  %v3542_v16 = vor.u32 %v3541_v17, %v3537_v49  ;;  %v3556_v21 = vshll.u32 %v9625_v35, 16  ;;  %v3546_v19 = vrot.slane %v3544_v34, 1 }
 0x42e   : > { %v9647_v3 = vsel %vm864_vm6, %v3530_v41, %v3534_v63  ;;  %v3553_v5 = vrot.slane %v3551_v8, 1  ;;  %v9658_v22 = vsel %vm8581_vm5, %v3301_v38, 0  ;;  %v8324_v41 = vld [vmem:[%s10224_s5 + $0x88] sm:$0xff]   ;;  %v8325_v8 = vld [vmem:[%s10224_s5 + $0x90] sm:$0xff]  }
 0x42f   : > { %v9651_v53 = vsel %vm8581_vm5, 0, %v3304_v47  ;;  %7323 = vmatprep.mubr.bf16.mxu0 %v9647_v3  ;;  %v9662_v6 = vsel %vm864_vm6, %v3542_v16, %v3546_v19  ;;  %v3558_v36 = vrot.slane %v3556_v21, 1  ;;  %v3568_v61 = vshll.u32 %v9658_v22, 16  ;;  %v8326_v16 = vld [vmem:[%s10224_s5 + $0x98] sm:$0xff]   ;;  %v8331_v19 = vld [vmem:[%s10224_s5 + $0xc0] sm:$0xff]  }
 0x430   : > { %v3554_v13 = vor.u32 %v3553_v5, %v3549_v28  ;;  %v3563_v0 = vshll.u32 %v9651_v53, 16  ;;  %v3561_v17 = vshrl.u32 %v9651_v53, 16  ;;  %v8328_v5 = vld [vmem:[%s10224_s5 + $0xa8] sm:$0xff]   ;;  %v8329_v28 = vld [vmem:[%s10224_s5 + $0xb0] sm:$0xff]   ;;  %v8330_v21 = vld [vmem:[%s10224_s5 + $0xb8] sm:$0xff]  }
 0x431   : > { %v3570_v63 = vrot.slane %v3568_v61, 1 }
 0x432   : > { %v3565_v47 = vrot.slane %v3563_v0, 1  ;;  %v9668_v34 = vsel %vm864_vm6, %v3554_v13, %v3558_v36  ;;  %v4053_v13 = vrot.slane %v9410_v58, 1  ;;  %v4056_v0 = vrot.slane %v9406_v55, 1 }
 0x433   : > { %v4054_v36 = vrot.slane %v9402_v62, 1  ;;  %v4059_v62 = vrot.slane %v9439_v7, 1 }
 0x434   : > { %v3566_v38 = vor.u32 %v3565_v47, %v3561_v17  ;;  %v4057_v47 = vrot.slane %v9398_v29, 1  ;;  %v8332_v17 = vld [vmem:[%s10224_s5 + $0xc8] sm:$0xff]   ;;  %v8333_v29 = vld [vmem:[%s10224_s5 + $0xd0] sm:$0xff]  }
 0x435   : > { %7324 = vmatmul.mubr.bf16.gmra.mrb[40].mxu0 %v9662_v6  ;;  %v9725_v61 = vsel %vm1521_vm8, %v4053_v13, %v4054_v36  ;;  %v8336_v13 = vld [vmem:[%s10224_s5 + $0xe8] sm:$0xff]  }
 0x436   : > { %7327 = vmatprep.mubr.bf16.mxu0 %v9668_v34  ;;  %v9672_v49 = vsel %vm864_vm6, %v3566_v38, %v3570_v63  ;;  %v9729_v38 = vsel %vm1521_vm8, %v4056_v0, %v4057_v47  ;;  %v4062_v63 = vrot.slane %v9428_v52, 1  ;;  %v4074_v47 = vrot.slane %v9510_v45, 1 }
 0x43d   : > { %7328 = vmatmul.mubr.bf16.gmra.mrb[44].mxu0 %v9672_v49 }
 0x43e   : > { %7347 = vmatprep.mubr.bf16.mxu0 %v8587_v25 }
 0x445   : > { %7348 = vmatmul.mubr.bf16.vlgmr.msra.gmra.mrb[16].mxu0 %v9410_v58 }
 0x446   : > { %7380 = vmatpush3.bf16.msra.mxu0 %v9568_v26  ;;  %7351 = vmatprep.mubr.bf16.mxu0 %v9406_v55  ;;  %v8327_v26 = vld [vmem:[%s10224_s5 + $0xa0] sm:$0xff]  }
 0x447   : > { %7381 = vmatprep.subr.bf16.mxu0 %v8324_v41 }
 0x44a   : > { %7382 = vmatpush3.bf16.msra.mxu0 %v8324_v41  ;;  %v4060_v41 = vrot.slane %v9424_v56, 1  ;;  %v8335_v56 = vld [vmem:[%s10224_s5 + $0xe0] sm:$0xff]  }
 0x44b   : > { %7383 = vmatprep.subr.bf16.mxu0 %v8325_v8 }
 0x44d   : > { %7352 = vmatmul.mubr.bf16.gmra.mrb[20].mxu0 %v9439_v7 }
 0x44e   : > { %7355 = vmatprep.mubr.bf16.mxu0 %v9428_v52  ;;  %7384 = vmatpush3.bf16.msra.mxu0 %v8325_v8  ;;  %v4063_v8 = vrot.slane %v9432_v4, 1  ;;  %v4065_v4 = vrot.slane %v9481_v18, 1 }
 0x44f   : > { %7385 = vmatprep.subr.bf16.mxu0 %v8326_v16 }
 0x452   : > { %7386 = vmatpush3.bf16.msra.mxu0 %v8326_v16  ;;  %v8334_v16 = vld [vmem:[%s10224_s5 + $0xd8] sm:$0xff]  }
 0x453   : > { %7387 = vmatprep.subr.bf16.mxu0 %v8327_v26 }
 0x455   : > { %7356 = vmatmul.mubr.bf16.gmra.mrb[24].mxu0 %v9481_v18 }
 0x456   : > { %7359 = vmatprep.mubr.bf16.mxu0 %v9473_v15  ;;  %7388 = vmatpush3.bf16.msra.mxu0 %v8327_v26  ;;  %v9743_v26 = vsel %vm1521_vm8, %v4059_v62, %v4060_v41  ;;  %v8338_v62 = vld [vmem:[%s10224_s5 + $0xf8] sm:$0xff]  }
 0x457   : > { %7389 = vmatprep.subr.bf16.mxu0 %v8328_v5 }
 0x45a   : > { %7390 = vmatpush3.bf16.msra.mxu0 %v8328_v5  ;;  %v9747_v5 = vsel %vm1521_vm8, %v4062_v63, %v4063_v8  ;;  %v4080_v8 = vrot.slane %v9550_v46, 1 }
 0x45b   : > { %7391 = vmatprep.subr.bf16.mxu0 %v8329_v28 }
 0x45d   : > { %7360 = vmatmul.mubr.bf16.gmra.mrb[28].mxu0 %v9520_v2 }
 0x45e   : > { %7363 = vmatprep.mubr.bf16.mxu0 %v9510_v45  ;;  %7392 = vmatpush3.bf16.msra.mxu0 %v8329_v28  ;;  %v4068_v28 = vrot.slane %v9473_v15, 1 }
 0x45f   : > { %7393 = vmatprep.subr.bf16.mxu0 %v8330_v21 }
 0x462   : > { %7394 = vmatpush3.bf16.msra.mxu0 %v8330_v21  ;;  %v4066_v21 = vrot.slane %v9469_v48, 1  ;;  %v4071_v48 = vrot.slane %v9520_v2, 1 }
 0x463   : > { %7427 = vmatprep.subr.bf16.mxu0 %v8331_v19 }
 0x464   : > { %v9761_v0 = vsel %vm1521_vm8, %v4065_v4, %v4066_v21  ;;  %v4083_v21 = vrot.slane %v9594_v40, 1 }
 0x465   : > { %7364 = vmatmul.mubr.bf16.gmra.mrb[32].mxu0 %v9557_v44 }
 0x466   : > { %7367 = vmatprep.mubr.bf16.mxu0 %v9550_v46 }
 0x46d   : > { %7368 = vmatmul.mubr.bf16.gmra.mrb[36].mxu0 %v9594_v40 }
 0x46e   : > { %7371 = vmatprep.mubr.bf16.mxu0 %v9604_v33 }
 0x475   : > { %7372 = vmatmul.mubr.bf16.gmra.mrb[40].mxu0 %v9616_v20 }
 0x476   : > { %7375 = vmatprep.mubr.bf16.mxu0 %v9632_v60 }
 0x47d   : > { %7376 = vmatmul.mubr.bf16.gmra.mrb[44].mxu0 %v9651_v53 }
 0x47e   : > { %7395 = vmatprep.mubr.bf16.mxu0 %v9000_v31 }
 0x485   : > { %7396 = vmatmul.mubr.bf16.vlgmr.msra.gmra.mrb[16].mxu0 %v9725_v61 }
 0x486   : > { %7428 = vmatpush3.bf16.msra.mxu0 %v8331_v19  ;;  %7399 = vmatprep.mubr.bf16.mxu0 %v9729_v38  ;;  %v4069_v19 = vrot.slane %v9463_v27, 1  ;;  %v8337_v27 = vld [vmem:[%s10224_s5 + $0xf0] sm:$0xff]  }
 0x487   : > { %7429 = vmatprep.subr.bf16.mxu0 %v8332_v17 }
 0x488   : > { %v9765_v36 = vsel %vm1521_vm8, %v4068_v28, %v4069_v19  ;;  %v4086_v19 = vrot.slane %v9604_v33, 1 }
 0x48a   : > { %7430 = vmatpush3.bf16.msra.mxu0 %v8332_v17  ;;  %v4072_v17 = vrot.slane %v9504_v42, 1  ;;  %v4077_v42 = vrot.slane %v9557_v44, 1 }
 0x48b   : > { %7431 = vmatprep.subr.bf16.mxu0 %v8333_v29 }
 0x48c   : > { %v9779_v63 = vsel %vm1521_vm8, %v4071_v48, %v4072_v17  ;;  %v4089_v48 = vrot.slane %v9616_v20, 1  ;;  %v4090_v17 = vrot.slane %v9636_v1, 1  ;;  %v8341_v1 = vld [vmem:[%s10224_s5 + $0x110] sm:$0xff]  }
 0x48d   : > { %7400 = vmatmul.mubr.bf16.gmra.mrb[20].mxu0 %v9743_v26 }
 0x48e   : > { %7403 = vmatprep.mubr.bf16.mxu0 %v9747_v5  ;;  %7432 = vmatpush3.bf16.msra.mxu0 %v8333_v29  ;;  %v4075_v29 = vrot.slane %v9500_v51, 1  ;;  %v8339_v51 = vld [vmem:[%s10224_s5 + $0x100] sm:$0xff]  }
 0x48f   : > { %7433 = vmatprep.subr.bf16.mxu0 %v8334_v16 }
 0x490   : > { %v9783_v41 = vsel %vm1521_vm8, %v4074_v47, %v4075_v29  ;;  %v4092_v47 = vrot.slane %v9632_v60, 1 }
 0x492   : > { %7434 = vmatpush3.bf16.msra.mxu0 %v8334_v16  ;;  %v4078_v16 = vrot.slane %v9543_v59, 1  ;;  %v4084_v59 = vrot.slane %v9590_v14, 1  ;;  %v4093_v14 = vrot.slane %v9625_v35, 1  ;;  %v8340_v35 = vld [vmem:[%s10224_s5 + $0x108] sm:$0xff]  }
 0x493   : > { %7435 = vmatprep.subr.bf16.mxu0 %v8335_v56 }
 0x494   : > { %v9794_v4 = vsel %vm1521_vm8, %v4077_v42, %v4078_v16  ;;  %v9822_v29 = vsel %vm1521_vm8, %v4092_v47, %v4093_v14  ;;  %v4096_v42 = vrot.slane %v9658_v22, 1  ;;  %v8343_v22 = vld [vmem:[%s10224_s5 + $0x120] sm:$0xff]   ;;  %v8345_v16 = vld [vmem:[%s10224_s5 + $0x130] sm:$0xff]  }
 0x495   : > { %7404 = vmatmul.mubr.bf16.gmra.mrb[24].mxu0 %v9761_v0  ;;  %v8351_v14 = vld [vmem:[%s10224_s5 + $0x160] sm:$0xff]  }
 0x496   : > { %7407 = vmatprep.mubr.bf16.mxu0 %v9765_v36  ;;  %7436 = vmatpush3.bf16.msra.mxu0 %v8335_v56  ;;  %v4081_v56 = vrot.slane %v9539_v11, 1  ;;  %v9806_v11 = vsel %vm1521_vm8, %v4083_v21, %v4084_v59  ;;  %v8347_v21 = vld [vmem:[%s10224_s5 + $0x140] sm:$0xff]  }
 0x497   : > { %7437 = vmatprep.subr.bf16.mxu0 %v8336_v13 }
 0x498   : > { %v9798_v28 = vsel %vm1521_vm8, %v4080_v8, %v4081_v56  ;;  %v8346_v56 = vld [vmem:[%s10224_s5 + $0x138] sm:$0xff]  }
 0x49a   : > { %7438 = vmatpush3.bf16.msra.mxu0 %v8336_v13  ;;  %v4087_v13 = vrot.slane %v9582_v9, 1  ;;  %v9818_v9 = vsel %vm1521_vm8, %v4089_v48, %v4090_v17  ;;  %v8348_v17 = vld [vmem:[%s10224_s5 + $0x148] sm:$0xff]  }
 0x49b   : > { %7439 = vmatprep.subr.bf16.mxu0 %v8337_v27 }
 0x49d   : > { %7408 = vmatmul.mubr.bf16.gmra.mrb[28].mxu0 %v9779_v63 }
 0x49e   : > { %7411 = vmatprep.mubr.bf16.mxu0 %v9783_v41  ;;  %7440 = vmatpush3.bf16.msra.mxu0 %v8337_v27  ;;  %v9810_v27 = vsel %vm1521_vm8, %v4086_v19, %v4087_v13  ;;  %v3306_v19 = vshrl.u32 %v9620_v39, 16  ;;  %v3309_v13 = vshll.u32 %v9620_v39, 16  ;;  %v8349_v39 = vld [vmem:[%s10224_s5 + $0x150] sm:$0xff]  }
 0x49f   : > { %7441 = vmatprep.subr.bf16.mxu0 %v8338_v62 }
 0x4a0   : > { %v3308_v59 = vrot.slane %v3306_v19, 7 }
 0x4a2   : > { %7442 = vmatpush3.bf16.msra.mxu0 %v8338_v62  ;;  %v4095_v62 = vrot.slane %v9651_v53, 1  ;;  %v3311_v48 = vor.u32 %v3309_v13, %v3308_v59 }
 0x4a3   : > { %7475 = vmatprep.subr.bf16.mxu0 %v8339_v51 }
 0x4a4   : > { %v9828_v8 = vsel %vm1521_vm8, %v4095_v62, %v4096_v42  ;;  %v9874_v47 = vsel %vm8581_vm5, 0, %v3311_v48  ;;  %v8352_v62 = vld [vmem:[%s10224_s5 + $0x168] sm:$0xff]   ;;  %v8353_v42 = vld [vmem:[%s10224_s5 + $0x170] sm:$0xff]  }
 0x4a5   : > { %7412 = vmatmul.mubr.bf16.gmra.mrb[32].mxu0 %v9794_v4 }
 0x4a6   : > { %7415 = vmatprep.mubr.bf16.mxu0 %v9798_v28 }
 0x4ad   : > { %7416 = vmatmul.mubr.bf16.gmra.mrb[36].mxu0 %v9806_v11 }
 0x4ae   : > { %7419 = vmatprep.mubr.bf16.mxu0 %v9810_v27 }
 0x4b5   : > { %7420 = vmatmul.mubr.bf16.gmra.mrb[40].mxu0 %v9818_v9 }
 0x4b6   : > { %7423 = vmatprep.mubr.bf16.mxu0 %v9822_v29 }
 0x4bd   : > { %7424 = vmatmul.mubr.bf16.gmra.mrb[44].mxu0 %v9828_v8 }
 0x4be   : > { %7443 = vmatprep.mubr.bf16.mxu0 %v9410_v58  ;;  %v8342_v58 = vld [vmem:[%s10224_s5 + $0x118] sm:$0xff]  }
 0x4c5   : > { %7444 = vmatmul.mubr.bf16.vlgmr.msra.gmra.mrb[16].mxu0 %v9406_v55 }
 0x4c6   : > { %7476 = vmatpush3.bf16.msra.mxu0 %v8339_v51  ;;  %7447 = vmatprep.mubr.bf16.mxu0 %v9439_v7  ;;  %v8344_v51 = vld [vmem:[%s10224_s5 + $0x128] sm:$0xff]  }
 0x4c7   : > { %7477 = vmatprep.subr.bf16.mxu0 %v8340_v35 }
 0x4ca   : > { %7478 = vmatpush3.bf16.msra.mxu0 %v8340_v35  ;;  %v8354_v35 = vld [vmem:[%s10224_s5 + $0x178] sm:$0xff]  }
 0x4cb   : > { %7479 = vmatprep.subr.bf16.mxu0 %v8341_v1 }
 0x4cd   : > { %7448 = vmatmul.mubr.bf16.gmra.mrb[20].mxu0 %v9428_v52 }
 0x4ce   : > { %7451 = vmatprep.mubr.bf16.mxu0 %v9481_v18  ;;  %7480 = vmatpush3.bf16.msra.mxu0 %v8341_v1  ;;  %v8355_v1 = vld [vmem:[%s10224_s5 + $0x180] sm:$0xff]  }
 0x4cf   : > { %7481 = vmatprep.subr.bf16.mxu0 %v8342_v58 }
 0x4d2   : > { %7482 = vmatpush3.bf16.msra.mxu0 %v8342_v58  ;;  %v10236_v58 = vld [vmem:[#allocation6_spill] sm:$0xff] }
 0x4d3   : > { %7483 = vmatprep.subr.bf16.mxu0 %v8343_v22 }
 0x4d5   : > { %7452 = vmatmul.mubr.bf16.gmra.mrb[24].mxu0 %v9473_v15 }
 0x4d6   : > { %7455 = vmatprep.mubr.bf16.mxu0 %v9520_v2  ;;  %7484 = vmatpush3.bf16.msra.mxu0 %v8343_v22  ;;  %v4633_v22 = vshll.u32 %v9874_v47, 16 }
 0x4d7   : > { %7485 = vmatprep.subr.bf16.mxu0 %v8344_v51 }
 0x4da   : > { %7486 = vmatpush3.bf16.msra.mxu0 %v8344_v51  ;;  %v3375_v51 = vsel %vm8581_vm5, %v3308_v59, 0  ;;  %v8357_v59 = vld [vmem:[%s10224_s5 + $0x190] sm:$0xff]  }
 0x4db   : > { %7487 = vmatprep.subr.bf16.mxu0 %v8345_v16 }
 0x4dd   : > { %7456 = vmatmul.mubr.bf16.gmra.mrb[28].mxu0 %v9510_v45 }
 0x4de   : > { %7459 = vmatprep.mubr.bf16.mxu0 %v9557_v44  ;;  %7488 = vmatpush3.bf16.msra.mxu0 %v8345_v16  ;;  %v4635_v16 = vrot.slane %v4633_v22, 1  ;;  %v8364_v22 = vld [vmem:[%s10224_s5 + $0x1c8] sm:$0xff]  }
 0x4df   : > { %7489 = vmatprep.subr.bf16.mxu0 %v8346_v56 }
 0x4e2   : > { %7490 = vmatpush3.bf16.msra.mxu0 %v8346_v56  ;;  %v4631_v56 = vshrl.u32 %v9874_v47, 16 }
 0x4e3   : > { %7523 = vmatprep.subr.bf16.mxu0 %v8347_v21 }
 0x4e4   : > { %v4636_v19 = vor.u32 %v4635_v16, %v4631_v56 }
 0x4e5   : > { %7460 = vmatmul.mubr.bf16.gmra.mrb[32].mxu0 %v9550_v46 }
 0x4e6   : > { %7463 = vmatprep.mubr.bf16.mxu0 %v9594_v40 }
 0x4ed   : > { %7464 = vmatmul.mubr.bf16.gmra.mrb[36].mxu0 %v9604_v33 }
 0x4ee   : > { %7467 = vmatprep.mubr.bf16.mxu0 %v9616_v20 }
 0x4f5   : > { %7468 = vmatmul.mubr.bf16.gmra.mrb[40].mxu0 %v9632_v60 }
 0x4f6   : > { %7471 = vmatprep.mubr.bf16.mxu0 %v9651_v53 }
 0x4fd   : > { %7472 = vmatmul.mubr.bf16.gmra.mrb[44].mxu0 %v9874_v47 }
 0x4fe   : > { %7491 = vmatprep.mubr.bf16.mxu0 %v9443_v57  ;;  %v8350_v57 = vld [vmem:[%s10224_s5 + $0x158] sm:$0xff]  }
 0x505   : > { %7492 = vmatmul.mubr.bf16.vlgmr.msra.gmra.mrb[16].mxu0 %v9448_v54 }
 0x506   : > { %7524 = vmatpush3.bf16.msra.mxu0 %v8347_v21  ;;  %7495 = vmatprep.mubr.bf16.mxu0 %v9484_v12  ;;  %v4638_v21 = vshll.u32 %v3375_v51, 16 }
 0x507   : > { %7525 = vmatprep.subr.bf16.mxu0 %v8348_v17 }
 0x508   : > { %v4640_v13 = vrot.slane %v4638_v21, 1 }
 0x50a   : > { %7526 = vmatpush3.bf16.msra.mxu0 %v8348_v17  ;;  %v9921_v48 = vsel %vm864_vm6, %v4636_v19, %v4640_v13  ;;  %v8359_v17 = vld [vmem:[%s10224_s5 + $0x1a0] sm:$0xff]  }
 0x50b   : > { %7527 = vmatprep.subr.bf16.mxu0 %v8349_v39 }
 0x50d   : > { %7496 = vmatmul.mubr.bf16.gmra.mrb[20].mxu0 %v9491_v23 }
 0x50e   : > { %7499 = vmatprep.mubr.bf16.mxu0 %v9526_v37  ;;  %7528 = vmatpush3.bf16.msra.mxu0 %v8349_v39  ;;  %v8360_v39 = vld [vmem:[%s10224_s5 + $0x1a8] sm:$0xff]  }
 0x50f   : > { %7529 = vmatprep.subr.bf16.mxu0 %v8350_v57 }
 0x512   : > { %7530 = vmatpush3.bf16.msra.mxu0 %v8350_v57  ;;  %v8361_v57 = vld [vmem:[%s10224_s5 + $0x1b0] sm:$0xff]  }
 0x513   : > { %7531 = vmatprep.subr.bf16.mxu0 %v8351_v14 }
 0x515   : > { %7500 = vmatmul.mubr.bf16.gmra.mrb[24].mxu0 %v9534_v43 }
 0x516   : > { %7503 = vmatprep.mubr.bf16.mxu0 %v9571_v30  ;;  %7532 = vmatpush3.bf16.msra.mxu0 %v8351_v14  ;;  %v8362_v14 = vld [vmem:[%s10224_s5 + $0x1b8] sm:$0xff]  }
 0x517   : > { %7533 = vmatprep.subr.bf16.mxu0 %v8352_v62 }
 0x51a   : > { %7534 = vmatpush3.bf16.msra.mxu0 %v8352_v62  ;;  %v8363_v62 = vld [vmem:[%s10224_s5 + $0x1c0] sm:$0xff]  }
 0x51b   : > { %7535 = vmatprep.subr.bf16.mxu0 %v8353_v42 }
 0x51d   : > { %7504 = vmatmul.mubr.bf16.gmra.mrb[28].mxu0 %v9577_v10 }
 0x51e   : > { %7507 = vmatprep.mubr.bf16.mxu0 %v9607_v50  ;;  %7536 = vmatpush3.bf16.msra.mxu0 %v8353_v42  ;;  %v4903_v42 = vrot.slane %v9874_v47, 1 }
 0x51f   : > { %7537 = vmatprep.subr.bf16.mxu0 %v8354_v35 }
 0x522   : > { %7538 = vmatpush3.bf16.msra.mxu0 %v8354_v35  ;;  %v4904_v35 = vrot.slane %v3375_v51, 1  ;;  %v8365_v51 = vld [vmem:[%s10224_s5 + $0x1d0] sm:$0xff]  }
 0x523   : > { %7571 = vmatprep.subr.bf16.mxu0 %v8355_v1 }
 0x525   : > { %7508 = vmatmul.mubr.bf16.gmra.mrb[32].mxu0 %v10236_v58 }
 0x526   : > { %7511 = vmatprep.mubr.bf16.mxu0 %v9641_v32 }
 0x52d   : > { %7512 = vmatmul.mubr.bf16.gmra.mrb[36].mxu0 %v9647_v3 }
 0x52e   : > { %7515 = vmatprep.mubr.bf16.mxu0 %v9662_v6 }
 0x535   : > { %7516 = vmatmul.mubr.bf16.gmra.mrb[40].mxu0 %v9668_v34 }
 0x536   : > { %7519 = vmatprep.mubr.bf16.mxu0 %v9672_v49 }
 0x53d   : > { %7520 = vmatmul.mubr.bf16.gmra.mrb[44].mxu0 %v9921_v48 }
 0x53e   : > { %7539 = vmatprep.mubr.bf16.mxu0 %v9725_v61  ;;  %v8358_v61 = vld [vmem:[%s10224_s5 + $0x198] sm:$0xff]  }
 0x545   : > { %7540 = vmatmul.mubr.bf16.vlgmr.msra.gmra.mrb[16].mxu0 %v9729_v38 }
 0x546   : > { %7572 = vmatpush3.bf16.msra.mxu0 %v8355_v1  ;;  %7543 = vmatprep.mubr.bf16.mxu0 %v9743_v26  ;;  %v9965_v1 = vsel %vm1521_vm8, %v4903_v42, %v4904_v35 }
 0x547   : > { %7573 = vmatprep.subr.bf16.mxu0 %v8356_v24 }
 0x54a   : > { %7574 = vmatpush3.bf16.msra.mxu0 %v8356_v24 }
 0x54b   : > { %7575 = vmatprep.subr.bf16.mxu0 %v8357_v59 }
 0x54d   : > { %7544 = vmatmul.mubr.bf16.gmra.mrb[20].mxu0 %v9747_v5 }
 0x54e   : > { %7547 = vmatprep.mubr.bf16.mxu0 %v9761_v0  ;;  %7576 = vmatpush3.bf16.msra.mxu0 %v8357_v59 }
 0x54f   : > { %7577 = vmatprep.subr.bf16.mxu0 %v8358_v61 }
 0x552   : > { %7578 = vmatpush3.bf16.msra.mxu0 %v8358_v61 }
 0x553   : > { %7579 = vmatprep.subr.bf16.mxu0 %v8359_v17 }
 0x555   : > { %7548 = vmatmul.mubr.bf16.gmra.mrb[24].mxu0 %v9765_v36 }
 0x556   : > { %7551 = vmatprep.mubr.bf16.mxu0 %v9779_v63  ;;  %7580 = vmatpush3.bf16.msra.mxu0 %v8359_v17 }
 0x557   : > { %7581 = vmatprep.subr.bf16.mxu0 %v8360_v39 }
 0x55a   : > { %7582 = vmatpush3.bf16.msra.mxu0 %v8360_v39 }
 0x55b   : > { %7583 = vmatprep.subr.bf16.mxu0 %v8361_v57 }
 0x55d   : > { %7552 = vmatmul.mubr.bf16.gmra.mrb[28].mxu0 %v9783_v41 }
 0x55e   : > { %7555 = vmatprep.mubr.bf16.mxu0 %v9794_v4  ;;  %7584 = vmatpush3.bf16.msra.mxu0 %v8361_v57 }
 0x55f   : > { %7585 = vmatprep.subr.bf16.mxu0 %v8362_v14 }
 0x562   : > { %7586 = vmatpush3.bf16.msra.mxu0 %v8362_v14 }
 0x563   : > { %7619 = vmatprep.subr.bf16.mxu0 %v8363_v62 }
 0x565   : > { %7556 = vmatmul.mubr.bf16.gmra.mrb[32].mxu0 %v9798_v28 }
 0x566   : > { %7559 = vmatprep.mubr.bf16.mxu0 %v9806_v11 }
 0x56d   : > { %7560 = vmatmul.mubr.bf16.gmra.mrb[36].mxu0 %v9810_v27 }
 0x56e   : > { %7563 = vmatprep.mubr.bf16.mxu0 %v9818_v9 }
 0x575   : > { %7564 = vmatmul.mubr.bf16.gmra.mrb[40].mxu0 %v9822_v29 }
 0x576   : > { %7567 = vmatprep.mubr.bf16.mxu0 %v9828_v8 }
 0x57d   : > { %7568 = vmatmul.mubr.bf16.gmra.mrb[44].mxu0 %v9965_v1 }
 0x57e   : > { %7587 = vmatprep.mubr.bf16.mxu0 %v9406_v55  ;;  %v8366_v55 = vld [vmem:[%s10224_s5 + $0x1d8] sm:$0xff]  }
 0x585   : > { %7588 = vmatmul.mubr.bf16.vlgmr.msra.gmra.mrb[16].mxu0 %v9439_v7  ;;  %v8368_v7 = vld [vmem:[%s10224_s5 + $0x1e8] sm:$0xff]  }
 0x586   : > { %7620 = vmatpush3.bf16.msra.mxu0 %v8363_v62  ;;  %7591 = vmatprep.mubr.bf16.mxu0 %v9428_v52  ;;  %v8367_v52 = vld [vmem:[%s10224_s5 + $0x1e0] sm:$0xff]  }
 0x587   : > { %7621 = vmatprep.subr.bf16.mxu0 %v8364_v22 }
 0x58a   : > { %7622 = vmatpush3.bf16.msra.mxu0 %v8364_v22 }
 0x58b   : > { %7623 = vmatprep.subr.bf16.mxu0 %v8365_v51 }
 0x58d   : > { %7592 = vmatmul.mubr.bf16.gmra.mrb[20].mxu0 %v9481_v18  ;;  %v8370_v18 = vld [vmem:[%s10224_s5 + $0x1f8] sm:$0xff]  }
 0x58e   : > { %7595 = vmatprep.mubr.bf16.mxu0 %v9473_v15  ;;  %7624 = vmatpush3.bf16.msra.mxu0 %v8365_v51  ;;  %v8369_v15 = vld [vmem:[%s10224_s5 + $0x1f0] sm:$0xff]  }
 0x58f   : > { %7625 = vmatprep.subr.bf16.mxu0 %v8366_v55 }
 0x592   : > { %7626 = vmatpush3.bf16.msra.mxu0 %v8366_v55 }
 0x593   : > { %7627 = vmatprep.subr.bf16.mxu0 %v8367_v52 }
 0x595   : > { %7596 = vmatmul.mubr.bf16.gmra.mrb[24].mxu0 %v9520_v2  ;;  %v8372_v2 = vld [vmem:[%s10224_s5 + $0x208] sm:$0xff]  }
 0x596   : > { %7599 = vmatprep.mubr.bf16.mxu0 %v9510_v45  ;;  %7628 = vmatpush3.bf16.msra.mxu0 %v8367_v52  ;;  %v8371_v45 = vld [vmem:[%s10224_s5 + $0x200] sm:$0xff]  }
 0x597   : > { %7629 = vmatprep.subr.bf16.mxu0 %v8368_v7 }
 0x59a   : > { %7630 = vmatpush3.bf16.msra.mxu0 %v8368_v7 }
 0x59b   : > { %7631 = vmatprep.subr.bf16.mxu0 %v8369_v15 }
 0x59d   : > { %7600 = vmatmul.mubr.bf16.gmra.mrb[28].mxu0 %v9557_v44  ;;  %v10067_v44 = vld [vmem:[%s10225_s6] ss:$0 sm:$0xff] }
 0x59e   : > { %7603 = vmatprep.mubr.bf16.mxu0 %v9550_v46  ;;  %7632 = vmatpush3.bf16.msra.mxu0 %v8369_v15  ;;  %v8373_v46 = vld [vmem:[%s10224_s5 + $0x210] sm:$0xff]  }
 0x59f   : > { %7633 = vmatprep.subr.bf16.mxu0 %v8370_v18 }
 0x5a2   : > { %7634 = vmatpush3.bf16.msra.mxu0 %v8370_v18 }
 0x5a3   : > { %7667 = vmatprep.subr.bf16.mxu0 %v8371_v45 }
 0x5a5   : > { %7604 = vmatmul.mubr.bf16.gmra.mrb[32].mxu0 %v9594_v40 }
 0x5a6   : > { %7607 = vmatprep.mubr.bf16.mxu0 %v9604_v33 }
 0x5ad   : > { %7608 = vmatmul.mubr.bf16.gmra.mrb[36].mxu0 %v9616_v20 }
 0x5ae   : > { %7611 = vmatprep.mubr.bf16.mxu0 %v9632_v60 }
 0x5b5   : > { %7612 = vmatmul.mubr.bf16.gmra.mrb[40].mxu0 %v9651_v53 }
 0x5b6   : > { %7615 = vmatprep.mubr.bf16.mxu0 %v9874_v47 }
 0x5bd   : > { %7616 = vmatmul.mubr.bf16.gmra.mrb[44].mxu0 %v8587_v25  ;;  %v8374_v25 = vld [vmem:[%s10224_s5 + $0x218] sm:$0xff]  }
 0x5be   : > { %7635 = vmatprep.mubr.bf16.mxu0 %v9448_v54  ;;  %v8375_v54 = vld [vmem:[%s10224_s5 + $0x220] sm:$0xff]  }
 0x5c5   : > { %7636 = vmatmul.mubr.bf16.vlgmr.msra.gmra.mrb[16].mxu0 %v9484_v12  ;;  %v8376_v12 = vld [vmem:[%s10224_s5 + $0x228] sm:$0xff]  }
 0x5c6   : > { %7668 = vmatpush3.bf16.msra.mxu0 %v8371_v45  ;;  %7639 = vmatprep.mubr.bf16.mxu0 %v9491_v23  ;;  %v8377_v23 = vld [vmem:[%s10224_s5 + $0x230] sm:$0xff]  }
 0x5c7   : > { %7669 = vmatprep.subr.bf16.mxu0 %v8372_v2 }
 0x5ca   : > { %7670 = vmatpush3.bf16.msra.mxu0 %v8372_v2 }
 0x5cb   : > { %7671 = vmatprep.subr.bf16.mxu0 %v8373_v46 }
 0x5cd   : > { %7640 = vmatmul.mubr.bf16.gmra.mrb[20].mxu0 %v9526_v37  ;;  %v8378_v37 = vld [vmem:[%s10224_s5 + $0x238] sm:$0xff]  }
 0x5ce   : > { %7643 = vmatprep.mubr.bf16.mxu0 %v9534_v43  ;;  %7672 = vmatpush3.bf16.msra.mxu0 %v8373_v46  ;;  %v10237_v43 = vld [vmem:[#allocation5_spill] sm:$0xff] }
 0x5cf   : > { %7673 = vmatprep.subr.bf16.mxu0 %v8374_v25 }
 0x5d2   : > { %7674 = vmatpush3.bf16.msra.mxu0 %v8374_v25 }
 0x5d3   : > { %7675 = vmatprep.subr.bf16.mxu0 %v8375_v54 }
 0x5d5   : > { %7644 = vmatmul.mubr.bf16.gmra.mrb[24].mxu0 %v9571_v30 }
 0x5d6   : > { %7647 = vmatprep.mubr.bf16.mxu0 %v9577_v10  ;;  %7676 = vmatpush3.bf16.msra.mxu0 %v8375_v54 }
 0x5d7   : > { %7677 = vmatprep.subr.bf16.mxu0 %v8376_v12 }
 0x5da   : > { %7678 = vmatpush3.bf16.msra.mxu0 %v8376_v12 }
 0x5db   : > { %7679 = vmatprep.subr.bf16.mxu0 %v8377_v23 }
 0x5dd   : > { %7648 = vmatmul.mubr.bf16.gmra.mrb[28].mxu0 %v9607_v50 }
 0x5de   : > { %7651 = vmatprep.mubr.bf16.mxu0 %v10236_v58  ;;  %7680 = vmatpush3.bf16.msra.mxu0 %v8377_v23 }
 0x5df   : > { %7681 = vmatprep.subr.bf16.mxu0 %v8378_v37 }
 0x5e2   : > { %7682 = vmatpush3.bf16.msra.mxu0 %v8378_v37 }
 0x5e5   : > { %7652 = vmatmul.mubr.bf16.gmra.mrb[32].mxu0 %v9641_v32 }
 0x5e6   : > { %7655 = vmatprep.mubr.bf16.mxu0 %v9647_v3 }
 0x5ed   : > { %7656 = vmatmul.mubr.bf16.gmra.mrb[36].mxu0 %v9662_v6 }
 0x5ee   : > { %7659 = vmatprep.mubr.bf16.mxu0 %v9668_v34 }
 0x5f5   : > { %7660 = vmatmul.mubr.bf16.gmra.mrb[40].mxu0 %v9672_v49 }
 0x5f6   : > { %7663 = vmatprep.mubr.bf16.mxu0 %v9921_v48 }
 0x5fd   : > { %7664 = vmatmul.mubr.bf16.gmra.mrb[44].mxu0 %v10237_v43 }
 0x5fe   : > { %7683 = vmatprep.mubr.bf16.mxu0 %v9729_v38 }
 0x605   : > { %7684 = vmatmul.mubr.bf16.vlgmr.msra.gmra.mrb[16].mxu0 %v9743_v26 }
 0x606   : > { %7687 = vmatprep.mubr.bf16.mxu0 %v9747_v5 }
 0x60d   : > { %7688 = vmatmul.mubr.bf16.gmra.mrb[20].mxu0 %v9761_v0 }
 0x60e   : > { %7691 = vmatprep.mubr.bf16.mxu0 %v9765_v36 }
 0x615   : > { %7692 = vmatmul.mubr.bf16.gmra.mrb[24].mxu0 %v9779_v63 }
 0x616   : > { %7695 = vmatprep.mubr.bf16.mxu0 %v9783_v41 }
 0x61d   : > { %7696 = vmatmul.mubr.bf16.gmra.mrb[28].mxu0 %v9794_v4 }
 0x61e   : > { %7699 = vmatprep.mubr.bf16.mxu0 %v9798_v28 }
 0x625   : > { %7700 = vmatmul.mubr.bf16.gmra.mrb[32].mxu0 %v9806_v11 }
 0x626   : > { %7703 = vmatprep.mubr.bf16.mxu0 %v9810_v27 }
 0x62d   : > { %7704 = vmatmul.mubr.bf16.gmra.mrb[36].mxu0 %v9818_v9 }
 0x62e   : > { %7707 = vmatprep.mubr.bf16.mxu0 %v9822_v29 }
 0x635   : > { %7708 = vmatmul.mubr.bf16.gmra.mrb[40].mxu0 %v9828_v8 }
 0x636   : > { %7711 = vmatprep.mubr.bf16.mxu0 %v9965_v1 }
 0x63d   : > { %7712 = vmatmul.mubr.bf16.gmra.mrb[44].mxu0 %v9000_v31 }
 0x6d8   : > { %v7685_v30 = vpop.f32.mrb[16].mxu0 }
 0x6d9   : > { %v5947_v10 = vadd.f32 %v7685_v30, %v10067_v44  ;;  %v5780_v40 = vpop.f32.mrb[17].mxu0 }
 0x6da   : > { %v5945_v33 = vadd.f32 %v10067_v44, %v5780_v40  ;;  %v7686_v50 = vpop.f32.mrb[18].mxu0 }
 0x6db   : > { %5980 = vst.msk [vmem:[%s10071_s9 + $0x10] sm:$0xff] %vm5977_vm9, %v5947_v10  ;;  %v5948_v31 = vadd.f32 %v7686_v50, %v10067_v44  ;;  %v5783_v20 = vpop.f32.mrb[19].mxu0 }
 0x6dc   : > { %5978 = vst.msk [vmem:[%s10071_s9] sm:$0xff] %vm5977_vm9, %v5945_v33  ;;  %v5946_v60 = vadd.f32 %v10067_v44, %v5783_v20 }
 0x6dd   : > { %5981 = vst.msk [vmem:[%s10071_s9 + $0x18] sm:$0xff] %vm5977_vm9, %v5948_v31 }
 0x6de   : > { %5979 = vst.msk [vmem:[%s10071_s9 + $0x8] sm:$0xff] %vm5977_vm9, %v5946_v60 }
 0x6e0   : > { %v7689_v32 = vpop.f32.mrb[20].mxu0 }
 0x6e1   : > { %v5951_v3 = vadd.f32 %v7689_v32, %v10067_v44  ;;  %v5796_v53 = vpop.f32.mrb[21].mxu0 }
 0x6e2   : > { %v5949_v6 = vadd.f32 %v10067_v44, %v5796_v53  ;;  %v7690_v34 = vpop.f32.mrb[22].mxu0 }
 0x6e3   : > { %5984 = vst.msk [vmem:[%s10071_s9 + $0x30] sm:$0xff] %vm5977_vm9, %v5951_v3  ;;  %v5952_v49 = vadd.f32 %v7690_v34, %v10067_v44  ;;  %v5799_v38 = vpop.f32.mrb[23].mxu0 }
 0x6e4   : > { %5982 = vst.msk [vmem:[%s10071_s9 + $0x20] sm:$0xff] %vm5977_vm9, %v5949_v6  ;;  %v5950_v26 = vadd.f32 %v10067_v44, %v5799_v38 }
 0x6e5   : > { %5985 = vst.msk [vmem:[%s10071_s9 + $0x38] sm:$0xff] %vm5977_vm9, %v5952_v49 }
 0x6e6   : > { %5983 = vst.msk [vmem:[%s10071_s9 + $0x28] sm:$0xff] %vm5977_vm9, %v5950_v26 }
 0x6e8   : > { %v7693_v5 = vpop.f32.mrb[24].mxu0 }
 0x6e9   : > { %v5955_v0 = vadd.f32 %v7693_v5, %v10067_v44  ;;  %v5812_v36 = vpop.f32.mrb[25].mxu0 }
 0x6ea   : > { %v5953_v63 = vadd.f32 %v10067_v44, %v5812_v36  ;;  %v7694_v41 = vpop.f32.mrb[26].mxu0 }
 0x6eb   : > { %5988 = vst.msk [vmem:[%s10071_s9 + $0x50] sm:$0xff] %vm5977_vm9, %v5955_v0  ;;  %v5956_v4 = vadd.f32 %v7694_v41, %v10067_v44  ;;  %v5815_v28 = vpop.f32.mrb[27].mxu0 }
 0x6ec   : > { %5986 = vst.msk [vmem:[%s10071_s9 + $0x40] sm:$0xff] %vm5977_vm9, %v5953_v63  ;;  %v5954_v11 = vadd.f32 %v10067_v44, %v5815_v28 }
 0x6ed   : > { %5989 = vst.msk [vmem:[%s10071_s9 + $0x58] sm:$0xff] %vm5977_vm9, %v5956_v4 }
 0x6ee   : > { %5987 = vst.msk [vmem:[%s10071_s9 + $0x48] sm:$0xff] %vm5977_vm9, %v5954_v11 }
 0x6f0   : > { %v7697_v27 = vpop.f32.mrb[28].mxu0 }
 0x6f1   : > { %v5959_v9 = vadd.f32 %v7697_v27, %v10067_v44  ;;  %v5828_v29 = vpop.f32.mrb[29].mxu0 }
 0x6f2   : > { %v5957_v8 = vadd.f32 %v10067_v44, %v5828_v29  ;;  %v7698_v47 = vpop.f32.mrb[30].mxu0 }
 0x6f3   : > { %5992 = vst.msk [vmem:[%s10071_s9 + $0x70] sm:$0xff] %vm5977_vm9, %v5959_v9  ;;  %v5960_v58 = vadd.f32 %v7698_v47, %v10067_v44  ;;  %v5831_v16 = vpop.f32.mrb[31].mxu0 }
 0x6f4   : > { %5990 = vst.msk [vmem:[%s10071_s9 + $0x60] sm:$0xff] %vm5977_vm9, %v5957_v8  ;;  %v5958_v56 = vadd.f32 %v10067_v44, %v5831_v16 }
 0x6f5   : > { %5993 = vst.msk [vmem:[%s10071_s9 + $0x78] sm:$0xff] %vm5977_vm9, %v5960_v58 }
 0x6f6   : > { %5991 = vst.msk [vmem:[%s10071_s9 + $0x68] sm:$0xff] %vm5977_vm9, %v5958_v56 }
 0x6f8   : > { %v7701_v21 = vpop.f32.mrb[32].mxu0 }
 0x6f9   : > { %v5963_v19 = vadd.f32 %v7701_v21, %v10067_v44  ;;  %v5844_v13 = vpop.f32.mrb[33].mxu0 }
 0x6fa   : > { %v5961_v48 = vadd.f32 %v10067_v44, %v5844_v13  ;;  %v7702_v24 = vpop.f32.mrb[34].mxu0 }
 0x6fb   : > { %5996 = vst.msk [vmem:[%s10071_s9 + $0x90] sm:$0xff] %vm5977_vm9, %v5963_v19  ;;  %v5964_v59 = vadd.f32 %v7702_v24, %v10067_v44  ;;  %v5847_v61 = vpop.f32.mrb[35].mxu0 }
 0x6fc   : > { %5994 = vst.msk [vmem:[%s10071_s9 + $0x80] sm:$0xff] %vm5977_vm9, %v5961_v48  ;;  %v5962_v17 = vadd.f32 %v10067_v44, %v5847_v61 }
 0x6fd   : > { %5997 = vst.msk [vmem:[%s10071_s9 + $0x98] sm:$0xff] %vm5977_vm9, %v5964_v59 }
 0x6fe   : > { %5995 = vst.msk [vmem:[%s10071_s9 + $0x88] sm:$0xff] %vm5977_vm9, %v5962_v17 }
 0x700   : > { %v7705_v39 = vpop.f32.mrb[36].mxu0 }
 0x701   : > { %v5967_v57 = vadd.f32 %v7705_v39, %v10067_v44  ;;  %v5860_v14 = vpop.f32.mrb[37].mxu0 }
 0x702   : > { %v5965_v62 = vadd.f32 %v10067_v44, %v5860_v14  ;;  %v7706_v42 = vpop.f32.mrb[38].mxu0 }
 0x703   : > { %6000 = vst.msk [vmem:[%s10071_s9 + $0xb0] sm:$0xff] %vm5977_vm9, %v5967_v57  ;;  %v5968_v35 = vadd.f32 %v7706_v42, %v10067_v44  ;;  %v5863_v1 = vpop.f32.mrb[39].mxu0 }
 0x704   : > { %5998 = vst.msk [vmem:[%s10071_s9 + $0xa0] sm:$0xff] %vm5977_vm9, %v5965_v62  ;;  %v5966_v22 = vadd.f32 %v10067_v44, %v5863_v1 }
 0x705   : > { %6001 = vst.msk [vmem:[%s10071_s9 + $0xb8] sm:$0xff] %vm5977_vm9, %v5968_v35 }
 0x706   : > { %5999 = vst.msk [vmem:[%s10071_s9 + $0xa8] sm:$0xff] %vm5977_vm9, %v5966_v22 }
 0x708   : > { %v7709_v51 = vpop.f32.mrb[40].mxu0 }
 0x709   : > { %v5971_v55 = vadd.f32 %v7709_v51, %v10067_v44  ;;  %v5876_v52 = vpop.f32.mrb[41].mxu0 }
 0x70a   : > { %v5969_v7 = vadd.f32 %v10067_v44, %v5876_v52  ;;  %v7710_v15 = vpop.f32.mrb[42].mxu0 }
 0x70b   : > { %6004 = vst.msk [vmem:[%s10071_s9 + $0xd0] sm:$0xff] %vm5977_vm9, %v5971_v55  ;;  %v5972_v18 = vadd.f32 %v7710_v15, %v10067_v44  ;;  %v5879_v45 = vpop.f32.mrb[43].mxu0 }
 0x70c   : > { %6002 = vst.msk [vmem:[%s10071_s9 + $0xc0] sm:$0xff] %vm5977_vm9, %v5969_v7  ;;  %v5970_v2 = vadd.f32 %v10067_v44, %v5879_v45 }
 0x70d   : > { %6005 = vst.msk [vmem:[%s10071_s9 + $0xd8] sm:$0xff] %vm5977_vm9, %v5972_v18 }
 0x70e   : > { %6003 = vst.msk [vmem:[%s10071_s9 + $0xc8] sm:$0xff] %vm5977_vm9, %v5970_v2 }
 0x710   : > { %v7713_v46 = vpop.f32.mrb[44].mxu0 }
 0x711   : > { %v5975_v25 = vadd.f32 %v7713_v46, %v10067_v44  ;;  %v5892_v54 = vpop.f32.mrb[45].mxu0 }
 0x712   : > { %v5973_v12 = vadd.f32 %v10067_v44, %v5892_v54  ;;  %v7714_v23 = vpop.f32.mrb[46].mxu0 }
 0x713   : > { %6008 = vst.msk [vmem:[%s10071_s9 + $0xf0] sm:$0xff] %vm5977_vm9, %v5975_v25  ;;  %v5976_v37 = vadd.f32 %v7714_v23, %v10067_v44  ;;  %v5895_v43 = vpop.f32.mrb[47].mxu0 }
 0x714   : > { %6006 = vst.msk [vmem:[%s10071_s9 + $0xe0] sm:$0xff] %vm5977_vm9, %v5973_v12  ;;  %v5974_v30 = vadd.f32 %v10067_v44, %v5895_v43 }
 0x715   : > { %6009 = vst.msk [vmem:[%s10071_s9 + $0xf8] sm:$0xff] %vm5977_vm9, %v5976_v37 }
 0x716   : > { %6007 = vst.msk [vmem:[%s10071_s9 + $0xe8] sm:$0xff] %vm5977_vm9, %v5974_v30 }
 0x717   : > { %8392 = shalt.err (!%p8389_p3)
}
 0x718   : > { %s8393_s22 = scalar_lea.hbm %s10165_s17, 4096  ;;  %s8397_s8 = scalar_lea.hbm %s10226_s7, 8192 }
 0x719   : > { %p8394_p4 = scmp.ne.s32.totalorder %s10165_s17, %s8393_s22  ;;  %p8398_p9 = scmp.lt.u32.totalorder %s10165_s17, %s10226_s7 }
 0x71a   : > { %p8399_p10 = scmp.lt.u32.totalorder %s8397_s8, %s8393_s22  ;;  %p8401_p12 = scmp.lt.u32.totalorder %s8393_s22, %s10165_s17 }
 0x71b   : > { %p8395_p7 = pnand %p8394_p4, %p8526_p5 }
 0x71c   : > { %p8400_p11 = por %p8399_p10, %p8398_p9 }
 0x71d   : > { %p8396_p8 = pneg %p8395_p7 }
 0x71e   : > { %p8402_p13 = por %p8401_p12, %p8400_p11 }
 0x720   : > { %p8403_p0 = pnand %p8402_p13, %p8396_p8 }
 0x722   : > { %8406 = shalt.err (!%p8403_p0)
}
 0x723   : > { %s8446_s15 = smov 128   ;;  %s8447_s16 = smov 8  }
 0x724   : > { %8229 = dma.vmem_to_hbm [thread:$0]  (%p8526_p5), %s10167_s14, 4096, %s10165_s17, %s10178_s28, %s8446_s15, %s8446_s15, %s8447_s16  }
 0x725 PF: > { %p8235_p1 = scmp.ge.s32.totalorder %s8441_s27, 2  ;;  %s6039_s18 = sand.u32 1, %s8429_s24  }
 0x726   : > { %s6040_s19 = scalar_lea.sflag [#allocation3], %s6039_s18 }
 0x727   : > { %p8232_p2 = pnand %p8235_p1, %p8530_p6 }
 0x729   : > { %8424 = dma.done.wait (!%p8232_p2), %s6040_s19, 4096  }
 0x72a   : > { %8426 = vsyncadd (!%p8232_p2), %s6040_s19, 4294963200  ;;  %p17_p3 = scmp.ge.s32.totalorder %s8513_s30, 4   ;;  %s10238_s24 = smov %s8433_s25 }
 0x72b   : > { %s10239_s25 = smov %s8437_s26  ;;  %s10240_s26 = smov %s8524_s10 }
 0x72c   : > { %s10241_s27 = smov %s8513_s30  ;;  %19 = sbr.rel (!%p17_p3) target bundleno = 3 (0x3), region = 99 }
 0x733   :  { %6045 = vsyncpa [#allocation3], 1 }
 0x734   :  { %6047 = vsyncpa [#allocation3 + $0x1], 1 }

</bundles_post_ra>
